<compile_context>
chip_gen: v7x
topology: tpu7x:2x2x1
jax: 0.10.0
libtpu: 0.0.40
codegen_flags: <defaults>
</compile_context>

<pallas_src>
import jax
import jax.numpy as jnp
from jax import lax
from jax.experimental import pallas as pl
from jax.experimental.pallas import tpu as pltpu

K1 = 10          # conv1 kernel width
K2 = 3           # TemporalConvUnit kernel width
PAD1 = 5         # conv1 padding along W
BN_EPS = 1e-5


def _round_up(n, m):
    return ((n + m - 1) // m) * m


# ----------------------------------------------------------------------------
# Pallas kernel: one grid step handles batch_block elements as one M-folded slab
# ----------------------------------------------------------------------------
def _make_kernel(batch_block, m1p, m1):
    inv_pool = 1.0 / float(m1)

    def kernel(xcol_ref,                               # (BM, Kp)   bf16 im2col slab
               w1_ref,                                 # (Kp, Cp)   bf16
               u1w_ref, u2w_ref,                       # (3*Cp, Cp) bf16
               sew1_ref, sew2_ref,                     # (Cp, Crp), (Crp, Cp) bf16
               vecs_ref,                               # (8, Cp)    f32 packed vectors
               mfirst_ref, mlast_ref, valid_ref,       # (BM, 1)    f32 row masks
               out_ref):                               # (BM, Cp)   bf16
        mask_first = mfirst_ref[...]                   # 0 where w == 0 or pad row
        mask_last = mlast_ref[...]                     # 0 where w == W1-1 or pad row
        valid = valid_ref[...]                         # 0 on pad rows
        vecs = vecs_ref[...]
        b1 = vecs[0:1, :]
        u1b, bn1s, bn1t = vecs[1:2, :], vecs[2:3, :], vecs[3:4, :]
        u2b, bn2s, bn2t = vecs[4:5, :], vecs[5:6, :], vecs[6:7, :]

        # conv1: a single im2col matmul over all batch_block * H * (W+1) rows.
        y = jnp.dot(xcol_ref[...], w1_ref[...],
                    preferred_element_type=jnp.float32) + b1
        bm, cp = y.shape

        def unit(y, uw_ref, ub, s, t):
            # (1,3) conv (zero padded along W) + folded eval-mode BN + ReLU.
            # Shifted taps via pltpu.roll (XLU slot); per-row masks kill
            # leakage across W-row, H-row and batch-element boundaries.
            prev = pltpu.roll(y, shift=1, axis=0) * mask_first        # y[w-1]
            nxt = pltpu.roll(y, shift=bm - 1, axis=0) * mask_last     # y[w+1]
            ycat = jnp.concatenate([prev.astype(jnp.bfloat16),
                                    y.astype(jnp.bfloat16),
                                    nxt.astype(jnp.bfloat16)], axis=1)
            z = jnp.dot(ycat, uw_ref[...],
                        preferred_element_type=jnp.float32) + ub
            z = z * s + t
            return jnp.maximum(z, 0.0)

        y = unit(y, u1w_ref, u1b, bn1s, bn1t)
        y = unit(y, u2w_ref, u2b, bn2s, bn2t)

        # --- Squeeze-and-Excitation, batched across the whole block ---
        y3 = (y * valid).reshape(batch_block, m1p, cp)
        pooled = jnp.sum(y3, axis=1) * inv_pool                        # (Bblk, Cp)
        h1 = jnp.maximum(
            jnp.dot(pooled.astype(jnp.bfloat16), sew1_ref[...],
                    preferred_element_type=jnp.float32), 0.0)          # (Bblk, Crp)
        logits = jnp.dot(h1.astype(jnp.bfloat16), sew2_ref[...],
                         preferred_element_type=jnp.float32)           # (Bblk, Cp)
        gate = pl.reciprocal(1.0 + jnp.exp(-logits), approx=True)      # sigmoid (EUP)

        out = y.reshape(batch_block, m1p, cp) * gate.reshape(batch_block, 1, cp)
        out_ref[...] = out.reshape(bm, cp).astype(out_ref.dtype)

    return kernel


# ----------------------------------------------------------------------------
# Wrapper: parameter folding / layout glue + pallas_call
# ----------------------------------------------------------------------------
def time_conv_block(x, params, batch_block=None):
    """x: NCHW float32 (B, Cin, H, W). Returns NCHW (B, Cout, H, W+1)."""
    B, Cin, H, W = x.shape
    Cout = params["conv1_w"].shape[0]
    Cred = params["se_w1"].shape[0]
    W1 = W + 1
    M1 = H * W1
    M1p = _round_up(M1, 8)
    Kin = K1 * Cin
    Kp = _round_up(Kin, 128)
    Cp = _round_up(Cout, 128)
    Crp = _round_up(Cred, 128)

    # ---- batch_block: VMEM-budget-driven (sized against v7x's 64 MiB part),
    #      while keeping >= 4-8 grid steps so the pipeline overlaps DMA ----
    if batch_block is None:
        elem_bytes = (2 * M1p * (Kp + Cp) * 2      # double-buffered bf16 in/out blocks
                      + M1p * Cp * 4               # y (f32) live value
                      + M1p * 3 * Cp * 2           # ycat (bf16)
                      + 2 * M1p * Cp * 4)          # roll/mask transients (f32)
        weight_bytes = (2 * 2 * ((Kp + 2 * K2 * Cp + Crp) * Cp + Cp * Crp)
                        + 8 * Cp * 4 + 3 * M1p * 4 * 2)
        budget = 20 * 1024 * 1024                  # headroom inside the 48 MiB limit
        max_bb = max(1, (budget - weight_bytes) // elem_bytes)
        target_steps = 8 if B >= 8 else min(B, 4)
        bb = int(min(max_bb, max(1, B // max(target_steps, 1))))
        while B % bb:
            bb -= 1
        batch_block = bb
    assert B % batch_block == 0
    grid = (B // batch_block,)
    BM = batch_block * M1p

    # ---- im2col for conv1 (layout glue; tiny, fused by XLA under jit) ----
    x_nhwc = jnp.transpose(x, (0, 2, 3, 1))                          # (B,H,W,Cin)
    xpad = jnp.pad(x_nhwc, ((0, 0), (0, 0), (PAD1, PAD1), (0, 0)))   # (B,H,W+10,Cin)
    xcol = jnp.concatenate([xpad[:, :, k:k + W1, :] for k in range(K1)],
                           axis=-1)                                  # (B,H,W1,K1*Cin)
    xcol = xcol.reshape(B, M1, Kin)
    # TODO(synk): when DMA-bound, drop the Kin->Kp HBM zero-pad (keep rows at
    # Kin) and pad inside the kernel instead; bf16 already halves the traffic.
    xcol = jnp.pad(xcol, ((0, 0), (0, M1p - M1), (0, Kp - Kin)))
    xcol = xcol.reshape(B * M1p, Kp).astype(jnp.bfloat16)            # (B*M1p, Kp)

    # ---- weights, zero-padded to lane-dense shapes, stored bf16 ----
    w1 = jnp.transpose(params["conv1_w"][:, :, 0, :], (2, 1, 0)).reshape(Kin, Cout)
    w1 = jnp.pad(w1, ((0, Kp - Kin), (0, Cp - Cout))).astype(jnp.bfloat16)
    b1 = jnp.pad(params["conv1_b"].reshape(1, Cout), ((0, 0), (0, Cp - Cout)))

    def unit_params(p):
        uw = jnp.transpose(p["conv_w"][:, :, 0, :], (2, 1, 0))       # (K2, Cin, Cout)
        uw = jnp.pad(uw, ((0, 0), (0, Cp - Cout), (0, Cp - Cout)))
        uw = uw.reshape(K2 * Cp, Cp).astype(jnp.bfloat16)            # taps stacked on K
        ub = jnp.pad(p["conv_b"].reshape(1, Cout), ((0, 0), (0, Cp - Cout)))
        scale = p["bn_gamma"] / jnp.sqrt(p["bn_var"] + BN_EPS)
        shift = p["bn_beta"] - p["bn_mean"] * scale
        scale = jnp.pad(scale.reshape(1, Cout), ((0, 0), (0, Cp - Cout)))
        shift = jnp.pad(shift.reshape(1, Cout), ((0, 0), (0, Cp - Cout)))
        return uw, ub, scale, shift

    u1w, u1b, bn1s, bn1t = unit_params(params["unit1"])
    u2w, u2b, bn2s, bn2t = unit_params(params["unit2"])

    sew1 = jnp.pad(params["se_w1"].T,
                   ((0, Cp - Cout), (0, Crp - Cred))).astype(jnp.bfloat16)
    sew2 = jnp.pad(params["se_w2"].T,
                   ((0, Crp - Cred), (0, Cp - Cout))).astype(jnp.bfloat16)

    # seven per-channel (1, Cp) vectors packed into a single (8, Cp) f32 slab
    vecs = jnp.concatenate([b1, u1b, bn1s, bn1t, u2b, bn2s, bn2t,
                            jnp.zeros((1, Cp), jnp.float32)], axis=0)

    # ---- per-row edge masks for one block (identical for every grid step) ----
    r = jnp.arange(BM)
    rl = r % M1p                       # row index within a batch element
    w_of = rl % W1
    valid = rl < M1
    mask_first = ((w_of != 0) & valid).astype(jnp.float32).reshape(BM, 1)
    mask_last = ((w_of != (W1 - 1)) & valid).astype(jnp.float32).reshape(BM, 1)
    mask_valid = valid.astype(jnp.float32).reshape(BM, 1)

    def rep(arr):
        nd = arr.ndim
        return pl.BlockSpec(arr.shape, lambda i, _nd=nd: (0,) * _nd)

    in_specs = [
        pl.BlockSpec((BM, Kp), lambda i: (i, 0)),
        rep(w1), rep(u1w), rep(u2w), rep(sew1), rep(sew2),
        rep(vecs), rep(mask_first), rep(mask_last), rep(mask_valid),
    ]
    out_spec = pl.BlockSpec((BM, Cp), lambda i: (i, 0))

    out_padded = pl.pallas_call(
        _make_kernel(batch_block, M1p, M1),
        out_shape=jax.ShapeDtypeStruct((B * M1p, Cp), jnp.bfloat16),
        grid_spec=pltpu.PrefetchScalarGridSpec(
            num_scalar_prefetch=0,
            grid=grid,
            in_specs=in_specs,
            out_specs=out_spec,
        ),
        compiler_params=pltpu.CompilerParams(
            dimension_semantics=("parallel",),
            vmem_limit_bytes=48 * 1024 * 1024),
    )(xcol, w1, u1w, u2w, sew1, sew2, vecs, mask_first, mask_last, mask_valid)

    # strip row / channel padding, back to NCHW (B, Cout, H, W+1)
    out = out_padded.astype(jnp.float32).reshape(B, M1p, Cp)[:, :M1, :Cout]
    out = out.reshape(B, H, W1, Cout)
    return jnp.transpose(out, (0, 3, 1, 2)).astype(x.dtype)


# ----------------------------------------------------------------------------
# Pure-JAX reference (eval-mode semantics, f32 HIGHEST) for correctness check
# ----------------------------------------------------------------------------
def reference(x, params):
    def conv(x, w, b, pad_w):
        y = lax.conv_general_dilated(
            x, w, window_strides=(1, 1),
            padding=((0, 0), (pad_w, pad_w)),
            dimension_numbers=("NCHW", "OIHW", "NCHW"),
            precision=lax.Precision.HIGHEST)
        return y + b[None, :, None, None]

    y = conv(x, params["conv1_w"], params["conv1_b"], PAD1)
    for key in ("unit1", "unit2"):
        p = params[key]
        y = conv(y, p["conv_w"], p["conv_b"], 1)
        y = (p["bn_gamma"][None, :, None, None]
             * (y - p["bn_mean"][None, :, None, None])
             / jnp.sqrt(p["bn_var"][None, :, None, None] + BN_EPS)
             + p["bn_beta"][None, :, None, None])
        y = jnp.maximum(y, 0.0)          # dropout: identity (eval)
    pooled = jnp.mean(y, axis=(2, 3))                                   # (B, Cout)
    h = jnp.maximum(
        jnp.dot(pooled, params["se_w1"].T, precision=lax.Precision.HIGHEST), 0.0)
    s = jax.nn.sigmoid(
        jnp.dot(h, params["se_w2"].T, precision=lax.Precision.HIGHEST))
    return y * s[:, :, None, None]


# ----------------------------------------------------------------------------
# Deterministic parameter init (shapes follow the PyTorch module __init__)
# ----------------------------------------------------------------------------
def init_params(key, in_channels, out_channels, reduction=16):
    c_red = out_channels // reduction

    def n(k, shape, scale=0.1):
        return scale * jax.random.normal(k, shape, jnp.float32)

    def unit(k):
        k1, k2, k3, k4, k5, k6 = jax.random.split(k, 6)
        return dict(
            conv_w=n(k1, (out_channels, out_channels, 1, K2)),
            conv_b=n(k2, (out_channels,)),
            bn_gamma=1.0 + n(k3, (out_channels,)),
            bn_beta=n(k4, (out_channels,)),
            bn_mean=n(k5, (out_channels,)),
            bn_var=jnp.abs(n(k6, (out_channels,))) + 0.5,
        )

    ks = jax.random.split(key, 6)
    return dict(
        conv1_w=n(ks[0], (out_channels, in_channels, 1, K1)),
        conv1_b=n(ks[1], (out_channels,)),
        unit1=unit(ks[2]),
        unit2=unit(ks[3]),
        se_w1=n(ks[4], (c_red, out_channels)),        # Linear(Cout -> Cout//16)
        se_w2=n(ks[5], (out_channels, c_red)),        # Linear(Cout//16 -> Cout)
    )


if __name__ == "__main__":
    key = jax.random.PRNGKey(0)
    kx, kp = jax.random.split(key)

    Cin, H, W = 4, 4, 16
    Cout = 32                                    # reduction=16 -> SE hidden = 2
    params = init_params(kp, Cin, Cout)
    fwd = jax.jit(time_conv_block)               # lets XLA fuse the layout glue

    # B=2 exercises batch_block=1 / grid=2; B=16 exercises batch_block=2 / grid=8
    for B in (2, 16):
        x = jax.random.normal(jax.random.fold_in(kx, B),
                              (B, Cin, H, W), jnp.float32)
        out = jax.block_until_ready(fwd(x, params))
        ref = jax.block_until_ready(reference(x, params))
        assert out.shape == (B, Cout, H, W + 1), out.shape
        max_err = float(jnp.max(jnp.abs(out - ref)))
        mean_err = float(jnp.mean(jnp.abs(out - ref)))
        # Kernel uses single-pass bf16 MXU matmuls and bf16 HBM storage; the
        # reference runs f32 HIGHEST, so allow bf16-level error.
        assert max_err < 1e-1 and mean_err < 1e-2, (B, max_err, mean_err)
    print("KERNEL_OK")
</pallas_src>

<mosaic_0001>
module attributes {stable_mosaic.version = 11 : i64} {
  func.func @kernel(%arg0: i32, %arg1: memref<72x128xbf16, #tpu.memory_space<vmem>>, %arg2: memref<128x128xbf16, #tpu.memory_space<vmem>>, %arg3: memref<384x128xbf16, #tpu.memory_space<vmem>>, %arg4: memref<384x128xbf16, #tpu.memory_space<vmem>>, %arg5: memref<128x128xbf16, #tpu.memory_space<vmem>>, %arg6: memref<128x128xbf16, #tpu.memory_space<vmem>>, %arg7: memref<8x128xf32, #tpu.memory_space<vmem>>, %arg8: memref<72x1xf32, #tpu.memory_space<vmem>>, %arg9: memref<72x1xf32, #tpu.memory_space<vmem>>, %arg10: memref<72x1xf32, #tpu.memory_space<vmem>>, %arg11: memref<72x128xbf16, #tpu.memory_space<vmem>>) attributes {dimension_semantics = [#tpu.dimension_semantics<parallel>], iteration_bounds = array<i64: 2>, scalar_prefetch = 0 : i64, scratch_operands = 0 : i64, tpu.core_type = #tpu.core_type<tc>, window_params = [{transform_indices = @transform_0, window_bounds = array<i64: 72, 128>}, {pipeline_mode = #tpu.pipeline_mode<synchronous>, transform_indices = @transform_1, window_bounds = array<i64: 128, 128>}, {pipeline_mode = #tpu.pipeline_mode<synchronous>, transform_indices = @transform_2, window_bounds = array<i64: 384, 128>}, {pipeline_mode = #tpu.pipeline_mode<synchronous>, transform_indices = @transform_3, window_bounds = array<i64: 384, 128>}, {pipeline_mode = #tpu.pipeline_mode<synchronous>, transform_indices = @transform_4, window_bounds = array<i64: 128, 128>}, {pipeline_mode = #tpu.pipeline_mode<synchronous>, transform_indices = @transform_5, window_bounds = array<i64: 128, 128>}, {pipeline_mode = #tpu.pipeline_mode<synchronous>, transform_indices = @transform_6, window_bounds = array<i64: 8, 128>}, {pipeline_mode = #tpu.pipeline_mode<synchronous>, transform_indices = @transform_7, window_bounds = array<i64: 72, 1>}, {pipeline_mode = #tpu.pipeline_mode<synchronous>, transform_indices = @transform_8, window_bounds = array<i64: 72, 1>}, {pipeline_mode = #tpu.pipeline_mode<synchronous>, transform_indices = @transform_9, window_bounds = array<i64: 72, 1>}, {transform_indices = @transform_10, window_bounds = array<i64: 72, 128>}]} {
    %c0 = arith.constant 0 : index
    %c0_0 = arith.constant 0 : index
    %0 = vector.load %arg8[%c0, %c0_0] : memref<72x1xf32, #tpu.memory_space<vmem>>, vector<72x1xf32>
    %c0_1 = arith.constant 0 : index
    %c0_2 = arith.constant 0 : index
    %1 = vector.load %arg9[%c0_1, %c0_2] : memref<72x1xf32, #tpu.memory_space<vmem>>, vector<72x1xf32>
    %c0_3 = arith.constant 0 : index
    %c0_4 = arith.constant 0 : index
    %2 = vector.load %arg10[%c0_3, %c0_4] : memref<72x1xf32, #tpu.memory_space<vmem>>, vector<72x1xf32>
    %c0_5 = arith.constant 0 : index
    %c0_6 = arith.constant 0 : index
    %3 = vector.load %arg7[%c0_5, %c0_6] : memref<8x128xf32, #tpu.memory_space<vmem>>, vector<8x128xf32>
    %4 = vector.extract_strided_slice %3 {offsets = [0, 0], sizes = [1, 128], strides = [1, 1]} : vector<8x128xf32> to vector<1x128xf32>
    %5 = vector.extract_strided_slice %3 {offsets = [1, 0], sizes = [1, 128], strides = [1, 1]} : vector<8x128xf32> to vector<1x128xf32>
    %6 = vector.extract_strided_slice %3 {offsets = [2, 0], sizes = [1, 128], strides = [1, 1]} : vector<8x128xf32> to vector<1x128xf32>
    %7 = vector.extract_strided_slice %3 {offsets = [3, 0], sizes = [1, 128], strides = [1, 1]} : vector<8x128xf32> to vector<1x128xf32>
    %8 = vector.extract_strided_slice %3 {offsets = [4, 0], sizes = [1, 128], strides = [1, 1]} : vector<8x128xf32> to vector<1x128xf32>
    %9 = vector.extract_strided_slice %3 {offsets = [5, 0], sizes = [1, 128], strides = [1, 1]} : vector<8x128xf32> to vector<1x128xf32>
    %10 = vector.extract_strided_slice %3 {offsets = [6, 0], sizes = [1, 128], strides = [1, 1]} : vector<8x128xf32> to vector<1x128xf32>
    %c0_7 = arith.constant 0 : index
    %c0_8 = arith.constant 0 : index
    %11 = vector.load %arg1[%c0_7, %c0_8] : memref<72x128xbf16, #tpu.memory_space<vmem>>, vector<72x128xbf16>
    %c0_9 = arith.constant 0 : index
    %c0_10 = arith.constant 0 : index
    %12 = vector.load %arg2[%c0_9, %c0_10] : memref<128x128xbf16, #tpu.memory_space<vmem>>, vector<128x128xbf16>
    %cst = arith.constant dense<0.000000e+00> : vector<72x128xf32>
    %13 = tpu.matmul %11, %12, %cst {dimension_numbers = #tpu.dot_dimension_numbers<[1], [0], [0], [1], [0, 0, 1, 1], [], []>} : vector<72x128xbf16>, vector<128x128xbf16>, vector<72x128xf32> -> vector<72x128xf32>
    %14 = vector.broadcast %4 : vector<1x128xf32> to vector<72x128xf32>
    %15 = arith.addf %13, %14 : vector<72x128xf32>
    %c1_i32 = arith.constant 1 : i32
    %16 = tpu.dynamic_rotate %15 by %c1_i32 dim 0 : vector<72x128xf32>, i32 -> vector<72x128xf32>
    %17 = vector.broadcast %0 : vector<72x1xf32> to vector<72x128xf32>
    %18 = arith.mulf %16, %17 : vector<72x128xf32>
    %c71_i32 = arith.constant 71 : i32
    %19 = tpu.dynamic_rotate %15 by %c71_i32 dim 0 : vector<72x128xf32>, i32 -> vector<72x128xf32>
    %20 = vector.broadcast %1 : vector<72x1xf32> to vector<72x128xf32>
    %21 = arith.mulf %19, %20 : vector<72x128xf32>
    %22 = arith.truncf %18 : vector<72x128xf32> to vector<72x128xbf16>
    %23 = arith.truncf %15 : vector<72x128xf32> to vector<72x128xbf16>
    %24 = arith.truncf %21 : vector<72x128xf32> to vector<72x128xbf16>
    %25 = tpu.concatenate %22, %23, %24 in 1 : vector<72x128xbf16>, vector<72x128xbf16>, vector<72x128xbf16> -> vector<72x384xbf16>
    %c0_11 = arith.constant 0 : index
    %c0_12 = arith.constant 0 : index
    %26 = vector.load %arg3[%c0_11, %c0_12] : memref<384x128xbf16, #tpu.memory_space<vmem>>, vector<384x128xbf16>
    %cst_13 = arith.constant dense<0.000000e+00> : vector<72x128xf32>
    %27 = tpu.matmul %25, %26, %cst_13 {dimension_numbers = #tpu.dot_dimension_numbers<[1], [0], [0], [1], [0, 0, 1, 1], [], []>} : vector<72x384xbf16>, vector<384x128xbf16>, vector<72x128xf32> -> vector<72x128xf32>
    %28 = vector.broadcast %5 : vector<1x128xf32> to vector<72x128xf32>
    %29 = arith.addf %27, %28 : vector<72x128xf32>
    %30 = vector.broadcast %6 : vector<1x128xf32> to vector<72x128xf32>
    %31 = arith.mulf %29, %30 : vector<72x128xf32>
    %32 = vector.broadcast %7 : vector<1x128xf32> to vector<72x128xf32>
    %33 = arith.addf %31, %32 : vector<72x128xf32>
    %cst_14 = arith.constant 0.000000e+00 : f32
    %34 = vector.broadcast %cst_14 : f32 to vector<72x128xf32>
    %35 = arith.maximumf %33, %34 : vector<72x128xf32>
    %c1_i32_15 = arith.constant 1 : i32
    %36 = tpu.dynamic_rotate %35 by %c1_i32_15 dim 0 : vector<72x128xf32>, i32 -> vector<72x128xf32>
    %37 = vector.broadcast %0 : vector<72x1xf32> to vector<72x128xf32>
    %38 = arith.mulf %36, %37 : vector<72x128xf32>
    %c71_i32_16 = arith.constant 71 : i32
    %39 = tpu.dynamic_rotate %35 by %c71_i32_16 dim 0 : vector<72x128xf32>, i32 -> vector<72x128xf32>
    %40 = vector.broadcast %1 : vector<72x1xf32> to vector<72x128xf32>
    %41 = arith.mulf %39, %40 : vector<72x128xf32>
    %42 = arith.truncf %38 : vector<72x128xf32> to vector<72x128xbf16>
    %43 = arith.truncf %35 : vector<72x128xf32> to vector<72x128xbf16>
    %44 = arith.truncf %41 : vector<72x128xf32> to vector<72x128xbf16>
    %45 = tpu.concatenate %42, %43, %44 in 1 : vector<72x128xbf16>, vector<72x128xbf16>, vector<72x128xbf16> -> vector<72x384xbf16>
    %c0_17 = arith.constant 0 : index
    %c0_18 = arith.constant 0 : index
    %46 = vector.load %arg4[%c0_17, %c0_18] : memref<384x128xbf16, #tpu.memory_space<vmem>>, vector<384x128xbf16>
    %cst_19 = arith.constant dense<0.000000e+00> : vector<72x128xf32>
    %47 = tpu.matmul %45, %46, %cst_19 {dimension_numbers = #tpu.dot_dimension_numbers<[1], [0], [0], [1], [0, 0, 1, 1], [], []>} : vector<72x384xbf16>, vector<384x128xbf16>, vector<72x128xf32> -> vector<72x128xf32>
    %48 = vector.broadcast %8 : vector<1x128xf32> to vector<72x128xf32>
    %49 = arith.addf %47, %48 : vector<72x128xf32>
    %50 = vector.broadcast %9 : vector<1x128xf32> to vector<72x128xf32>
    %51 = arith.mulf %49, %50 : vector<72x128xf32>
    %52 = vector.broadcast %10 : vector<1x128xf32> to vector<72x128xf32>
    %53 = arith.addf %51, %52 : vector<72x128xf32>
    %cst_20 = arith.constant 0.000000e+00 : f32
    %54 = vector.broadcast %cst_20 : f32 to vector<72x128xf32>
    %55 = arith.maximumf %53, %54 : vector<72x128xf32>
    %56 = vector.broadcast %2 : vector<72x1xf32> to vector<72x128xf32>
    %57 = arith.mulf %55, %56 : vector<72x128xf32>
    %58 = vector.shape_cast %57 : vector<72x128xf32> to vector<1x72x128xf32>
    %cst_21 = arith.constant dense<0.000000e+00> : vector<1x128xf32>
    %59 = vector.multi_reduction <add>, %58, %cst_21 [1] : vector<1x72x128xf32> to vector<1x128xf32>
    %cst_22 = arith.constant 0.0147058824 : f32
    %60 = vector.broadcast %cst_22 : f32 to vector<1x128xf32>
    %61 = arith.mulf %59, %60 : vector<1x128xf32>
    %62 = arith.truncf %61 : vector<1x128xf32> to vector<1x128xbf16>
    %c0_23 = arith.constant 0 : index
    %c0_24 = arith.constant 0 : index
    %63 = vector.load %arg5[%c0_23, %c0_24] : memref<128x128xbf16, #tpu.memory_space<vmem>>, vector<128x128xbf16>
    %cst_25 = arith.constant dense<0.000000e+00> : vector<1x128xf32>
    %64 = tpu.matmul %62, %63, %cst_25 {dimension_numbers = #tpu.dot_dimension_numbers<[1], [0], [0], [1], [0, 0, 1, 1], [], []>} : vector<1x128xbf16>, vector<128x128xbf16>, vector<1x128xf32> -> vector<1x128xf32>
    %cst_26 = arith.constant 0.000000e+00 : f32
    %65 = vector.broadcast %cst_26 : f32 to vector<1x128xf32>
    %66 = arith.maximumf %64, %65 : vector<1x128xf32>
    %67 = arith.truncf %66 : vector<1x128xf32> to vector<1x128xbf16>
    %c0_27 = arith.constant 0 : index
    %c0_28 = arith.constant 0 : index
    %68 = vector.load %arg6[%c0_27, %c0_28] : memref<128x128xbf16, #tpu.memory_space<vmem>>, vector<128x128xbf16>
    %cst_29 = arith.constant dense<0.000000e+00> : vector<1x128xf32>
    %69 = tpu.matmul %67, %68, %cst_29 {dimension_numbers = #tpu.dot_dimension_numbers<[1], [0], [0], [1], [0, 0, 1, 1], [], []>} : vector<1x128xbf16>, vector<128x128xbf16>, vector<1x128xf32> -> vector<1x128xf32>
    %cst_30 = arith.constant 0.000000e+00 : f32
    %70 = vector.broadcast %cst_30 : f32 to vector<1x128xf32>
    %71 = arith.subf %70, %69 : vector<1x128xf32>
    %72 = math.exp %71 : vector<1x128xf32>
    %cst_31 = arith.constant 1.000000e+00 : f32
    %73 = vector.broadcast %cst_31 : f32 to vector<1x128xf32>
    %74 = arith.addf %73, %72 : vector<1x128xf32>
    %75 = tpu.reciprocal %74 {approx = true} : vector<1x128xf32> -> vector<1x128xf32>
    %76 = vector.shape_cast %55 : vector<72x128xf32> to vector<1x72x128xf32>
    %77 = vector.shape_cast %75 : vector<1x128xf32> to vector<1x1x128xf32>
    %78 = vector.broadcast %77 : vector<1x1x128xf32> to vector<1x72x128xf32>
    %79 = arith.mulf %76, %78 : vector<1x72x128xf32>
    %80 = vector.shape_cast %79 : vector<1x72x128xf32> to vector<72x128xf32>
    %81 = arith.truncf %80 : vector<72x128xf32> to vector<72x128xbf16>
    %c0_32 = arith.constant 0 : index
    %c0_33 = arith.constant 0 : index
    %82 = vector.load %arg11[%c0_32, %c0_33] : memref<72x128xbf16, #tpu.memory_space<vmem>>, vector<72x128xbf16>
    tpu.vector_store %arg11[%c0_32, %c0_33], %81 {strides = array<i32>} : memref<72x128xbf16, #tpu.memory_space<vmem>>, vector<72x128xbf16>,
    return
  }
  func.func @transform_0(%arg0: i32) -> (i32, i32) {
    %c0_i32 = arith.constant 0 : i32
    %c0_i32_0 = arith.constant 0 : i32
    return %arg0, %c0_i32 : i32, i32
  }
  func.func @transform_1(%arg0: i32) -> (i32, i32) {
    %c0_i32 = arith.constant 0 : i32
    %c0_i32_0 = arith.constant 0 : i32
    %c0_i32_1 = arith.constant 0 : i32
    return %c0_i32, %c0_i32_0 : i32, i32
  }
  func.func @transform_2(%arg0: i32) -> (i32, i32) {
    %c0_i32 = arith.constant 0 : i32
    %c0_i32_0 = arith.constant 0 : i32
    %c0_i32_1 = arith.constant 0 : i32
    return %c0_i32, %c0_i32_0 : i32, i32
  }
  func.func @transform_3(%arg0: i32) -> (i32, i32) {
    %c0_i32 = arith.constant 0 : i32
    %c0_i32_0 = arith.constant 0 : i32
    %c0_i32_1 = arith.constant 0 : i32
    return %c0_i32, %c0_i32_0 : i32, i32
  }
  func.func @transform_4(%arg0: i32) -> (i32, i32) {
    %c0_i32 = arith.constant 0 : i32
    %c0_i32_0 = arith.constant 0 : i32
    %c0_i32_1 = arith.constant 0 : i32
    return %c0_i32, %c0_i32_0 : i32, i32
  }
  func.func @transform_5(%arg0: i32) -> (i32, i32) {
    %c0_i32 = arith.constant 0 : i32
    %c0_i32_0 = arith.constant 0 : i32
    %c0_i32_1 = arith.constant 0 : i32
    return %c0_i32, %c0_i32_0 : i32, i32
  }
  func.func @transform_6(%arg0: i32) -> (i32, i32) {
    %c0_i32 = arith.constant 0 : i32
    %c0_i32_0 = arith.constant 0 : i32
    %c0_i32_1 = arith.constant 0 : i32
    return %c0_i32, %c0_i32_0 : i32, i32
  }
  func.func @transform_7(%arg0: i32) -> (i32, i32) {
    %c0_i32 = arith.constant 0 : i32
    %c0_i32_0 = arith.constant 0 : i32
    %c0_i32_1 = arith.constant 0 : i32
    return %c0_i32, %c0_i32_0 : i32, i32
  }
  func.func @transform_8(%arg0: i32) -> (i32, i32) {
    %c0_i32 = arith.constant 0 : i32
    %c0_i32_0 = arith.constant 0 : i32
    %c0_i32_1 = arith.constant 0 : i32
    return %c0_i32, %c0_i32_0 : i32, i32
  }
  func.func @transform_9(%arg0: i32) -> (i32, i32) {
    %c0_i32 = arith.constant 0 : i32
    %c0_i32_0 = arith.constant 0 : i32
    %c0_i32_1 = arith.constant 0 : i32
    return %c0_i32, %c0_i32_0 : i32, i32
  }
  func.func @transform_10(%arg0: i32) -> (i32, i32) {
    %c0_i32 = arith.constant 0 : i32
    %c0_i32_0 = arith.constant 0 : i32
    return %arg0, %c0_i32 : i32, i32
  }
}

</mosaic_0001>

<bundles_post_ra>
// kernel: time_conv_block.1
= control target key start
LH: loop header
LB: loop body
LE: loop exit
PB: predicated region body
PF: predicated region fallthrough
CT: control target
= control target key end

     0   :  { %s2535_s13 = smov 0   ;;  %s3371_s0 = inlined_call_operand.vmem [shape: bf16[144,128], index: 0, kind: input, shape index: {}]   ;;  %s3372_s1 = inlined_call_operand.vmem [shape: bf16[128,128], index: 1, kind: input, shape index: {}]   ;;  %s3373_s2 = inlined_call_operand.vmem [shape: bf16[384,128], index: 2, kind: input, shape index: {}]   ;;  %s3374_s3 = inlined_call_operand.vmem [shape: bf16[384,128], index: 3, kind: input, shape index: {}]   ;;  %s3375_s4 = inlined_call_operand.vmem [shape: bf16[128,128], index: 4, kind: input, shape index: {}]   ;;  %s3376_s5 = inlined_call_operand.vmem [shape: bf16[128,128], index: 5, kind: input, shape index: {}]   ;;  %s3377_s6 = inlined_call_operand.vmem [shape: f32[8,128], index: 6, kind: input, shape index: {}]   ;;  %s3378_s7 = inlined_call_operand.vmem [shape: f32[72,1], index: 7, kind: input, shape index: {}]   ;;  %s3379_s8 = inlined_call_operand.vmem [shape: f32[72,1], index: 8, kind: input, shape index: {}]   ;;  %s3380_s9 = inlined_call_operand.vmem [shape: f32[72,1], index: 9, kind: input, shape index: {}]   ;;  %s3381_s10 = inlined_call_operand.vmem [shape: bf16[144,128], index: 10, kind: output, shape index: {}]  }
   0x1 LB: > { %s1951_s14 = sadd.s32 4294967295, %s2475_s13   ;;  %p1955_p0 = scmp.ge.s32.totalorder %s2475_s13, 1  ;;  %s2475_s13 = sphi %s2535_s13, %s20_s13  }
   0x2   : > { %p313_p1 = scmp.lt.s32.totalorder %s2475_s13, 3 }
   0x4   : > { %p314_p2 = pnand %p1955_p0, %p313_p1 }
   0x5   : > { %v2388_v0 = vld [vmem:[%s3372_s1] sm:$0xff] (!%p314_p2)   ;;  %v2477_v1 = vmov (!%p314_p2), 0.0   ;;  %v2389_v2 = vld [vmem:[%s3372_s1 + $0x8] sm:$0xff] (!%p314_p2)   ;;  %vm2478_vm0 = vmmov (!%p314_p2), 0   ;;  %s351_s19 = smul.u32 (!%p314_p2), 9, %s1951_s14  ;;  %v2479_v3 = vmov (!%p314_p2), 0  }
   0x6   : > { %317 = sbr.rel (%p314_p2) target bundleno = 1297 (0x511), region = 60  ;;  %2227 = vmatprep.subr.bf16.mxu0 (!%p314_p2), %v2477_v1  ;;  %2243 = vmatprep.mubr.msk.bf16.mxu0 (!%p314_p2), %vm2478_vm0, %v2477_v1  ;;  %v2390_v4 = vld [vmem:[%s3372_s1 + $0x10] sm:$0xff] (!%p314_p2)   ;;  %v364_v5 = vld [vmem:[%s3378_s7] sm:$0xff] (!%p314_p2)  ;;  %v2391_v7 = vld [vmem:[%s3372_s1 + $0x18] sm:$0xff] (!%p314_p2)  }
   0x7   : > { %2228 = vmatpush3.bf16.msra.mxu0 (!%p314_p2), %v2388_v0  ;;  %p352_p3 = scmp.lt.s32.totalorder (!%p314_p2), %s351_s19, 17  ;;  %2386 = vset.pattern.permute.xlu0 (!%p314_p2), %v2479_v3  ;;  %v373_v6 = vld [vmem:[%s3379_s8] sm:$0xff] (!%p314_p2)  ;;  %v365_v8 = vld [vmem:[%s3378_s7 + $0x8] sm:$0xff] (!%p314_p2)  ;;  %v366_v11 = vld [vmem:[%s3378_s7 + $0x10] sm:$0xff] (!%p314_p2) }
   0x8   : > { %2229 = vmatprep.subr.bf16.mxu0 (!%p314_p2), %v2477_v1  ;;  %2387 = vset.pattern.permute.xlu1 (!%p314_p2), %v2479_v3  ;;  %v374_v9 = vld [vmem:[%s3379_s8 + $0x8] sm:$0xff] (!%p314_p2)  ;;  %v2392_v10 = vld [vmem:[%s3372_s1 + $0x20] sm:$0xff] (!%p314_p2)   ;;  %v367_v12 = vld [vmem:[%s3378_s7 + $0x18] sm:$0xff] (!%p314_p2)  ;;  %v417_v3 = vlaneseq (!%p314_p2) }
   0x9   : > { %592 = vperm.xlu0 (!%p314_p2), %2386, %v364_v5   ;;  %665 = vperm.xlu1 (!%p314_p2), %2387, %v373_v6   ;;  %v2393_v13 = vld [vmem:[%s3372_s1 + $0x28] sm:$0xff] (!%p314_p2)   ;;  %v375_v14 = vld [vmem:[%s3379_s8 + $0x10] sm:$0xff] (!%p314_p2)  ;;  %v376_v15 = vld [vmem:[%s3379_s8 + $0x18] sm:$0xff] (!%p314_p2) }
   0xa   : > { %v2394_v16 = vld [vmem:[%s3372_s1 + $0x30] sm:$0xff] (!%p314_p2)   ;;  %v368_v17 = vld [vmem:[%s3378_s7 + $0x20] sm:$0xff] (!%p314_p2)  ;;  %v369_v18 = vld [vmem:[%s3378_s7 + $0x28] sm:$0xff] (!%p314_p2) }
   0xb   : > { %2230 = vmatpush3.bf16.msra.mxu0 (!%p314_p2), %v2389_v2  ;;  %v2395_v19 = vld [vmem:[%s3372_s1 + $0x38] sm:$0xff] (!%p314_p2)   ;;  %v377_v20 = vld [vmem:[%s3379_s8 + $0x20] sm:$0xff] (!%p314_p2)  ;;  %v378_v21 = vld [vmem:[%s3379_s8 + $0x28] sm:$0xff] (!%p314_p2) }
   0xc   : > { %2231 = vmatprep.subr.bf16.mxu0 (!%p314_p2), %v2477_v1  ;;  %v370_v23 = vld [vmem:[%s3378_s7 + $0x30] sm:$0xff] (!%p314_p2)  ;;  %v371_v24 = vld [vmem:[%s3378_s7 + $0x38] sm:$0xff] (!%p314_p2)  ;;  %v2401_v25 = vld [vmem:[%s3373_s2 + $0x80] sm:$0xff] (!%p314_p2)  }
   0xd   : > { %s3383_s19 = smov (!%p352_p3, %s351_s19), 17  ;;  %597 = vperm.xlu0 %2386, %v365_v8   ;;  %670 = vperm.xlu1 %2387, %v374_v9   ;;  %v379_v26 = vld [vmem:[%s3379_s8 + $0x30] sm:$0xff]  ;;  %v380_v27 = vld [vmem:[%s3379_s8 + $0x38] sm:$0xff]  ;;  %v2402_v28 = vld [vmem:[%s3373_s2 + $0x88] sm:$0xff]  }
   0xe   : > { %s1956_s22 = sshll.u32 %s3383_s19, 2  ;;  %v372_v30 = vld [vmem:[%s3378_s7 + $0x40] sm:$0xff]  ;;  %v2403_v32 = vld [vmem:[%s3373_s2 + $0x90] sm:$0xff]   ;;  %v383_v34 = vld [vmem:[%s3380_s9 + $0x8] sm:$0xff] }
   0xf   : > { %s2574_s11 = scalar_lea.vmem %s3371_s0, %s1956_s22  ;;  %2232 = vmatpush3.bf16.msra.mxu0 %v2390_v4  ;;  %v381_v31 = vld [vmem:[%s3379_s8 + $0x40] sm:$0xff]  ;;  %v2404_v35 = vld [vmem:[%s3373_s2 + $0x98] sm:$0xff]   ;;  %v384_v37 = vld [vmem:[%s3380_s9 + $0x10] sm:$0xff]  ;;  %v2764_v4 = vshrl.u32 %v417_v3, 7  ;;  %s361_s21 = scalar_lea.vmem %s3381_s10, %s1956_s22 }
  0x10   : > { %2233 = vmatprep.subr.bf16.mxu0 %v2477_v1  ;;  %v2396_v22 = vld [vmem:[%s2574_s11] sm:$0xff]   ;;  %v2397_v29 = vld [vmem:[%s2574_s11 + $0x8] sm:$0xff]   ;;  %v2398_v36 = vld [vmem:[%s2574_s11 + $0x10] sm:$0xff]  }
  0x11   : > { %602 = vperm.xlu0 %2386, %v366_v11   ;;  %607 = vperm.xlu1 %2387, %v367_v12   ;;  %v382_v33 = vld [vmem:[%s3380_s9] sm:$0xff]  ;;  %v385_v38 = vld [vmem:[%s3380_s9 + $0x18] sm:$0xff]  ;;  %v387_v40 = vld [vmem:[%s3380_s9 + $0x28] sm:$0xff]  ;;  %v419_v5 = vsub.s32 0, %v2764_v4  ;;  %vm653_vm1 = vcmp.lt.s32.totalorder %v2764_v4, 7  ;;  %vm580_vm2 = vcmp.lt.s32.totalorder %v2764_v4, 1 }
  0x12   : > { %v386_v39 = vld [vmem:[%s3380_s9 + $0x20] sm:$0xff]  ;;  %v2399_v41 = vld [vmem:[%s2574_s11 + $0x18] sm:$0xff]   ;;  %v388_v42 = vld [vmem:[%s3380_s9 + $0x30] sm:$0xff] }
  0x13   : > { %2234 = vmatpush3.bf16.msra.mxu0 %v2391_v7  ;;  %v389_v43 = vld [vmem:[%s3380_s9 + $0x38] sm:$0xff]  ;;  %v390_v44 = vld [vmem:[%s3380_s9 + $0x40] sm:$0xff]  ;;  %v2406_v47 = vld [vmem:[%s3373_s2 + $0xa8] sm:$0xff]  }
  0x14   : > { %2235 = vmatprep.subr.bf16.mxu0 %v2477_v1  ;;  %v2400_v45 = vld [vmem:[%s2574_s11 + $0x20] ss:$0 sps:$4 sm:$0xff]   ;;  %v2409_v50 = vld [vmem:[%s3373_s2 + $0xb0] sm:$0xff]   ;;  %v2410_v51 = vld [vmem:[%s3373_s2 + $0x48] sm:$0xff]  }
  0x15   : > { %675 = vperm.xlu0 %2386, %v375_v14   ;;  %680 = vperm.xlu1 %2387, %v376_v15   ;;  %v2405_v46 = vld [vmem:[%s3373_s2 + $0xa0] sm:$0xff]   ;;  %v2411_v52 = vld [vmem:[%s3373_s2 + $0x8] sm:$0xff]   ;;  %v2412_v53 = vld [vmem:[%s3373_s2 + $0xb8] sm:$0xff]  }
  0x16   : > { %v2407_v48 = vld [vmem:[%s3373_s2 + $0x40] sm:$0xff]   ;;  %v2413_v54 = vld [vmem:[%s3373_s2 + $0x50] sm:$0xff]   ;;  %v2415_v56 = vld [vmem:[%s3373_s2 + $0x58] sm:$0xff]  }
  0x17   : > { %2236 = vmatpush3.bf16.msra.mxu0 %v2392_v10  ;;  %v2408_v49 = vld [vmem:[%s3373_s2] sm:$0xff]   ;;  %2091 = vmatprep.subr.bf16.mxu1 %v2407_v48  ;;  %v2414_v55 = vld [vmem:[%s3373_s2 + $0x10] sm:$0xff]   ;;  %v2416_v57 = vld [vmem:[%s3373_s2 + $0x18] sm:$0xff]  }
  0x18   : > { %2237 = vmatprep.subr.bf16.mxu0 %v2477_v1  ;;  %2092 = vmatpush3.bf16.msra.mxu1 %v2408_v49  ;;  %v2417_v58 = vld [vmem:[%s3373_s2 + $0x60] sm:$0xff]   ;;  %v2419_v60 = vld [vmem:[%s3373_s2 + $0x68] sm:$0xff]   ;;  %v2421_v62 = vld [vmem:[%s3373_s2 + $0x70] sm:$0xff]  }
  0x19   : > { %612 = vperm.xlu0 %2386, %v368_v17   ;;  %617 = vperm.xlu1 %2387, %v369_v18   ;;  %v2418_v59 = vld [vmem:[%s3373_s2 + $0x20] sm:$0xff]   ;;  %v2420_v61 = vld [vmem:[%s3373_s2 + $0x28] sm:$0xff]   ;;  %v2422_v63 = vld [vmem:[%s3373_s2 + $0x30] sm:$0xff]  }
  0x1a   : > { %2093 = vmatprep.subr.bf16.mxu1 %v2410_v51  ;;  %v2423_v0 = vld [vmem:[%s3373_s2 + $0x78] sm:$0xff]   ;;  %v2772_v7 = vld [vmem:[%s3377_s6] sm:$0xff] }
  0x1b   : > { %2238 = vmatpush3.bf16.msra.mxu0 %v2393_v13  ;;  %v2424_v2 = vld [vmem:[%s3373_s2 + $0x38] sm:$0xff]   ;;  %v2779_v9 = vrot.slane %v2772_v7, %v419_v5 }
  0x1c   : > { %2239 = vmatprep.subr.bf16.mxu0 %v2477_v1  ;;  %2094 = vmatpush3.bf16.msra.mxu1 %v2411_v52 }
  0x1d   : > { %685 = vperm.xlu0 %2386, %v377_v20   ;;  %690 = vperm.xlu1 %2387, %v378_v21  }
  0x1e   : > { %2095 = vmatprep.subr.bf16.mxu1 %v2413_v54 }
  0x1f   : > { %2240 = vmatpush3.bf16.msra.mxu0 %v2394_v16 }
  0x20   : > { %2241 = vmatprep.subr.bf16.mxu0 %v2477_v1  ;;  %2096 = vmatpush3.bf16.msra.mxu1 %v2414_v55 }
  0x21   : > { %622 = vperm.xlu0 %2386, %v370_v23   ;;  %627 = vperm.xlu1 %2387, %v371_v24  }
  0x22   : > { %2097 = vmatprep.subr.bf16.mxu1 %v2415_v56 }
  0x23   : > { %2242 = vmatpush3.bf16.msra.mxu0 %v2395_v19 }
  0x24   : > { %2263 = vmatprep.subr.bf16.mxu0 %v2477_v1  ;;  %2098 = vmatpush3.bf16.msra.mxu1 %v2416_v57 }
  0x25   : > { %695 = vperm.xlu0 %2386, %v379_v26   ;;  %700 = vperm.xlu1 %2387, %v380_v27  }
  0x26   : > { %2244 = vmatmul.mubr.bf16.vlgmr.msra.gmra.mrb[0].mxu0 %v2396_v22  ;;  %2099 = vmatprep.subr.bf16.mxu1 %v2417_v58 }
  0x27   : > { %2247 = vmatprep.mubr.msk.bf16.mxu0 %vm2478_vm0, %v2477_v1  ;;  %2264 = vmatpush3.bf16.msra.mxu0 %v2401_v25 }
  0x28   : > { %2265 = vmatprep.subr.bf16.mxu0 %v2477_v1  ;;  %2100 = vmatpush3.bf16.msra.mxu1 %v2418_v59 }
  0x29   : > { %632 = vperm.xlu0 %2386, %v372_v30   ;;  %705 = vperm.xlu1 %2387, %v381_v31  }
  0x2a   : > { %2101 = vmatprep.subr.bf16.mxu1 %v2419_v60 }
  0x2b   : > { %2266 = vmatpush3.bf16.msra.mxu0 %v2402_v28 }
  0x2c   : > { %2267 = vmatprep.subr.bf16.mxu0 %v2477_v1  ;;  %2102 = vmatpush3.bf16.msra.mxu1 %v2420_v61 }
  0x2d   : > { %1553 = vperm.xlu0 %2386, %v382_v33   ;;  %1558 = vperm.xlu1 %2387, %v383_v34  }
  0x2e   : > { %2248 = vmatmul.mubr.bf16.gmra.mrb[4].mxu0 %v2397_v29  ;;  %2103 = vmatprep.subr.bf16.mxu1 %v2421_v62 }
  0x2f   : > { %2251 = vmatprep.mubr.msk.bf16.mxu0 %vm2478_vm0, %v2477_v1  ;;  %2268 = vmatpush3.bf16.msra.mxu0 %v2403_v32 }
  0x30   : > { %2269 = vmatprep.subr.bf16.mxu0 %v2477_v1  ;;  %2104 = vmatpush3.bf16.msra.mxu1 %v2422_v63 }
  0x31   : > { %1563 = vperm.xlu0 %2386, %v384_v37   ;;  %1568 = vperm.xlu1 %2387, %v385_v38  }
  0x32   : > { %2105 = vmatprep.subr.bf16.mxu1 %v2423_v0 }
  0x33   : > { %2270 = vmatpush3.bf16.msra.mxu0 %v2404_v35 }
  0x34   : > { %2271 = vmatprep.subr.bf16.mxu0 %v2477_v1  ;;  %2106 = vmatpush3.bf16.msra.mxu1 %v2424_v2 }
  0x35   : > { %1573 = vperm.xlu0 %2386, %v386_v39   ;;  %1578 = vperm.xlu1 %2387, %v387_v40  }
  0x36   : > { %2252 = vmatmul.mubr.bf16.gmra.mrb[8].mxu0 %v2398_v36 }
  0x37   : > { %2255 = vmatprep.mubr.msk.bf16.mxu0 %vm2478_vm0, %v2477_v1  ;;  %2272 = vmatpush3.bf16.msra.mxu0 %v2405_v46 }
  0x38   : > { %2273 = vmatprep.subr.bf16.mxu0 %v2477_v1 }
  0x39   : > { %1583 = vperm.xlu0 %2386, %v388_v42   ;;  %1588 = vperm.xlu1 %2387, %v389_v43  }
  0x3b   : > { %2274 = vmatpush3.bf16.msra.mxu0 %v2406_v47 }
  0x3c   : > { %2275 = vmatprep.subr.bf16.mxu0 %v2477_v1 }
  0x3d   : > { %1593 = vperm.xlu0 %2386, %v390_v44  }
  0x3e   : > { %2256 = vmatmul.mubr.bf16.gmra.mrb[12].mxu0 %v2399_v41 }
  0x3f   : > { %2259 = vmatprep.mubr.msk.bf16.mxu0 %vm2478_vm0, %v2477_v1  ;;  %2276 = vmatpush3.bf16.msra.mxu0 %v2409_v50 }
  0x40   : > { %2277 = vmatprep.subr.bf16.mxu0 %v2477_v1 }
  0x43   : > { %2278 = vmatpush3.bf16.msra.mxu0 %v2412_v53 }
  0x44   : > { %2299 = vmatprep.subr.bf16.mxu0 %v2477_v1 }
  0x46   : > { %2260 = vmatmul.mubr.bf16.gmra.mrb[16].mxu0 %v2400_v45 }
  0x47   : > { %2279 = vmatprep.mubr.msk.bf16.mxu0 %vm2478_vm0, %v2477_v1 }
  0x88   : > { %v2767_v6 = vpop.permute.xlu0 %592  ;;  %v2774_v8 = vpop.permute.xlu1 %665 }
  0x8c   : > { %v2781_v10 = vpop.permute.xlu0 %597  ;;  %v2783_v12 = vpop.permute.xlu1 %670 }
  0x90   : > { %v2794_v23 = vpop.permute.xlu0 %602  ;;  %v2796_v24 = vpop.permute.xlu1 %607 }
  0x94   : > { %v2816_v35 = vpop.permute.xlu0 %675  ;;  %v2818_v36 = vpop.permute.xlu1 %680 }
  0x98   : > { %v2843_v52 = vpop.permute.xlu0 %612  ;;  %v2847_v55 = vpop.permute.xlu1 %617 }
  0xf9   : > { %v531_v11 = vpop.f32.mrb[0].mxu0 }
  0xfa   : > { %v2786_v13 = vadd.f32 %v531_v11, %v2779_v9  ;;  %v2245_v14 = vpop.f32.mrb[1].mxu0 }
  0xfb   : > { %v534_v15 = vpop.f32.mrb[2].mxu0 }
  0xfc   : > { %v535_v16 = vadd.f32 %v534_v15, %v2779_v9  ;;  %v2246_v17 = vpop.f32.mrb[3].mxu0  ;;  %v569_v18 = vrot.slane %v2786_v13, 7  ;;  %v644_v19 = vrot.slane %v2786_v13, 1  ;;  %v2870_v15 = vpop.permute.xlu0 %685 }
  0xfe   : > { %v570_v20 = vrot.slane %v535_v16, 7  ;;  %v645_v21 = vrot.slane %v535_v16, 1  ;;  %v722_v22 = vpack.c.bf16 %v535_v16, %v2786_v13 }
 0x100   : > { %v661_v25 = vsel %vm653_vm1, %v644_v19, %v645_v21  ;;  %960 = vmatprep.mubr.bf16.mxu1 %v722_v22  ;;  %v2806_v26 = vsel %vm580_vm2, %v569_v18, %v570_v20  ;;  %v2874_v22 = vpop.permute.xlu1 %690 }
 0x101   : > { %v539_v27 = vpop.f32.mrb[4].mxu0  ;;  %v708_v41 = vmul.f32 %v2774_v8, %v661_v25 }
 0x102   : > { %v2809_v28 = vadd.f32 %v539_v27, %v2779_v9  ;;  %v2249_v29 = vpop.f32.mrb[5].mxu0 }
 0x103   : > { %v542_v30 = vpop.f32.mrb[6].mxu0 }
 0x104   : > { %v571_v31 = vrot.slane %v2809_v28, 7  ;;  %v646_v32 = vrot.slane %v2809_v28, 1  ;;  %v2814_v33 = vadd.f32 %v542_v30, %v2779_v9  ;;  %v2250_v34 = vpop.f32.mrb[7].mxu0 }
 0x106   : > { %v660_v37 = vsel %vm653_vm1, %v645_v21, %v646_v32  ;;  %v572_v38 = vrot.slane %v2814_v33, 7  ;;  %v647_v39 = vrot.slane %v2814_v33, 1  ;;  %v723_v40 = vpack.c.bf16 %v2814_v33, %v2809_v28 }
 0x107   : > { %v709_v42 = vmul.f32 %v2783_v12, %v660_v37  ;;  %v587_v43 = vsel %vm580_vm2, %v570_v20, %v571_v31 }
 0x108   : > { %v659_v44 = vsel %vm653_vm1, %v646_v32, %v647_v39  ;;  %v586_v45 = vsel %vm580_vm2, %v571_v31, %v572_v38  ;;  %v2835_v48 = vmul.f32 %v2794_v23, %v587_v43 }
 0x109   : > { %v547_v46 = vpop.f32.mrb[8].mxu0  ;;  %v727_v47 = vpack.c.bf16 %v709_v42, %v708_v41  ;;  %v2838_v49 = vmul.f32 %v2796_v24, %v586_v45  ;;  %v710_v0 = vmul.f32 %v2816_v35, %v659_v44 }
 0x10a   : > { %v2841_v50 = vadd.f32 %v547_v46, %v2779_v9  ;;  %v2253_v51 = vpop.f32.mrb[9].mxu0  ;;  %v2886_v46 = vpop.permute.xlu0 %622 }
 0x10b   : > { %v550_v53 = vpop.f32.mrb[10].mxu0  ;;  %2280 = vmatmul.mubr.bf16.vlgmr.msra.gmra.mrb[20].mxu0 %v727_v47  ;;  %v718_v54 = vpack.c.bf16 %v2838_v49, %v2835_v48  ;;  %v2888_v47 = vpop.permute.xlu1 %627  ;;  %v2425_v48 = vld [vmem:[%s3374_s3 + $0x80] sm:$0xff]   ;;  %v2426_v49 = vld [vmem:[%s3374_s3 + $0x88] sm:$0xff]  }
 0x10c   : > { %v573_v56 = vrot.slane %v2841_v50, 7  ;;  %v648_v57 = vrot.slane %v2841_v50, 1  ;;  %v2852_v58 = vadd.f32 %v550_v53, %v2779_v9  ;;  %v2254_v59 = vpop.f32.mrb[11].mxu0  ;;  %2283 = vmatprep.mubr.msk.bf16.mxu0 %vm2478_vm0, %v2477_v1  ;;  %2300 = vmatpush3.bf16.msra.mxu0 %v2425_v48 }
 0x10d   : > { %2301 = vmatprep.subr.bf16.mxu0 %v2477_v1 }
 0x10e   : > { %v574_v60 = vrot.slane %v2852_v58, 7  ;;  %v649_v61 = vrot.slane %v2852_v58, 1  ;;  %v658_v62 = vsel %vm653_vm1, %v647_v39, %v648_v57  ;;  %v724_v63 = vpack.c.bf16 %v2852_v58, %v2841_v50  ;;  %v2427_v50 = vld [vmem:[%s3374_s3 + $0x90] sm:$0xff]   ;;  %v2431_v58 = vld [vmem:[%s3374_s3 + $0xa0] sm:$0xff]  }
 0x10f   : > { %v711_v2 = vmul.f32 %v2818_v36, %v658_v62  ;;  %v585_v3 = vsel %vm580_vm2, %v572_v38, %v573_v56 }
 0x110   : > { %v657_v11 = vsel %vm653_vm1, %v648_v57, %v649_v61  ;;  %v584_v14 = vsel %vm580_vm2, %v573_v56, %v574_v60  ;;  %v639_v20 = vmul.f32 %v2843_v52, %v585_v3  ;;  %2302 = vmatpush3.bf16.msra.mxu0 %v2426_v49 }
 0x111   : > { %v555_v16 = vpop.f32.mrb[12].mxu0  ;;  %v728_v17 = vpack.c.bf16 %v711_v2, %v710_v0  ;;  %v640_v21 = vmul.f32 %v2847_v55, %v584_v14  ;;  %v712_v43 = vmul.f32 %v2870_v15, %v657_v11  ;;  %2303 = vmatprep.subr.bf16.mxu0 %v2477_v1 }
 0x112   : > { %v556_v25 = vadd.f32 %v555_v16, %v2779_v9  ;;  %v2257_v27 = vpop.f32.mrb[13].mxu0  ;;  %v2899_v16 = vpop.permute.xlu0 %695 }
 0x113   : > { %v558_v29 = vpop.f32.mrb[14].mxu0  ;;  %2284 = vmatmul.mubr.bf16.gmra.mrb[24].mxu0 %v728_v17  ;;  %v719_v30 = vpack.c.bf16 %v640_v21, %v639_v20  ;;  %v2901_v17 = vpop.permute.xlu1 %700 }
 0x114   : > { %v575_v31 = vrot.slane %v556_v25, 7  ;;  %v650_v32 = vrot.slane %v556_v25, 1  ;;  %v559_v34 = vadd.f32 %v558_v29, %v2779_v9  ;;  %v2258_v37 = vpop.f32.mrb[15].mxu0  ;;  %2287 = vmatprep.mubr.msk.bf16.mxu0 %vm2478_vm0, %v2477_v1  ;;  %v636_v29 = vmul.f32 %v2781_v10, %v2806_v26  ;;  %2304 = vmatpush3.bf16.msra.mxu0 %v2427_v50 }
 0x115   : > { %2305 = vmatprep.subr.bf16.mxu0 %v2477_v1  ;;  %v1087_v50 = vsub.s32 3, %v2764_v4 }
 0x116   : > { %v576_v38 = vrot.slane %v559_v34, 7  ;;  %v651_v39 = vrot.slane %v559_v34, 1  ;;  %v656_v41 = vsel %vm653_vm1, %v649_v61, %v650_v32  ;;  %v725_v42 = vpack.c.bf16 %v559_v34, %v556_v25  ;;  %v2936_v33 = vpop.permute.xlu0 %632 }
 0x117   : > { %v713_v44 = vmul.f32 %v2874_v22, %v656_v41  ;;  %v583_v45 = vsel %vm580_vm2, %v574_v60, %v575_v31  ;;  %v2920_v13 = vpop.permute.xlu1 %705  ;;  %v2432_v41 = vld [vmem:[%s3374_s3 + $0x48] sm:$0xff]  }
 0x118   : > { %v655_v51 = vsel %vm653_vm1, %v650_v32, %v651_v39  ;;  %v582_v53 = vsel %vm580_vm2, %v575_v31, %v576_v38  ;;  %v641_v59 = vmul.f32 %v2886_v46, %v583_v45  ;;  %v2437_v45 = vld [vmem:[%s3374_s3 + $0x10] sm:$0xff]  }
 0x119   : > { %v563_v56 = vpop.f32.mrb[16].mxu0  ;;  %v729_v57 = vpack.c.bf16 %v713_v44, %v712_v43  ;;  %v642_v61 = vmul.f32 %v2888_v47, %v582_v53  ;;  %v714_v31 = vmul.f32 %v2899_v16, %v655_v51  ;;  %v2438_v43 = vld [vmem:[%s3374_s3 + $0xb8] sm:$0xff]   ;;  %v2435_v44 = vld [vmem:[%s3374_s3 + $0x50] sm:$0xff]  }
 0x11a   : > { %v564_v62 = vadd.f32 %v563_v56, %v2779_v9  ;;  %v2261_v0 = vpop.f32.mrb[17].mxu0  ;;  %v2439_v51 = vld [vmem:[%s3374_s3 + $0x58] sm:$0xff]   ;;  %v2441_v56 = vld [vmem:[%s3374_s3 + $0x60] sm:$0xff]  }
 0x11b   : > { %v566_v60 = vpop.f32.mrb[18].mxu0  ;;  %2288 = vmatmul.mubr.bf16.gmra.mrb[28].mxu0 %v729_v57  ;;  %v720_v2 = vpack.c.bf16 %v642_v61, %v641_v59  ;;  %v2440_v53 = vld [vmem:[%s3374_s3 + $0x18] sm:$0xff]   ;;  %v2442_v57 = vld [vmem:[%s3374_s3 + $0x20] sm:$0xff]   ;;  %v2443_v59 = vld [vmem:[%s3374_s3 + $0x68] sm:$0xff]  }
 0x11c   : > { %v577_v3 = vrot.slane %v564_v62, 7  ;;  %v652_v11 = vrot.slane %v564_v62, 1  ;;  %v2262_v14 = vpop.f32.mrb[19].mxu0  ;;  %2291 = vmatprep.mubr.msk.bf16.mxu0 %vm2478_vm0, %v2477_v1  ;;  %v726_v28 = vpack.c.bf16 %v564_v62, %v564_v62  ;;  %v2444_v61 = vld [vmem:[%s3374_s3 + $0x28] sm:$0xff]   ;;  %v2445_v62 = vld [vmem:[%s3374_s3 + $0x70] sm:$0xff]   ;;  %v2447_v60 = vld [vmem:[%s3374_s3 + $0x78] sm:$0xff]  }
 0x11d   : > { %v2446_v0 = vld [vmem:[%s3374_s3 + $0x30] sm:$0xff]  }
 0x11e   : > { %v589_v20 = vsel %vm580_vm2, %v577_v3, %v569_v18  ;;  %v654_v9 = vsel %vm653_vm1, %v651_v39, %v652_v11  ;;  %v662_v21 = vsel %vm653_vm1, %v652_v11, %v644_v19  ;;  %v581_v25 = vsel %vm580_vm2, %v576_v38, %v577_v3  ;;  %v2430_v38 = vld [vmem:[%s3374_s3] sm:$0xff]   ;;  %v2436_v39 = vld [vmem:[%s3374_s3 + $0xb0] sm:$0xff]  }
 0x11f   : > { %v635_v27 = vmul.f32 %v2767_v6, %v589_v20  ;;  %v715_v18 = vmul.f32 %v2901_v17, %v654_v9  ;;  %v716_v19 = vmul.f32 %v2920_v13, %v662_v21 }
 0x121   : > { %v717_v32 = vpack.c.bf16 %v636_v29, %v635_v27  ;;  %v730_v34 = vpack.c.bf16 %v715_v18, %v714_v31  ;;  %v731_v26 = vpack.c.bf16 %v716_v19, %v716_v19 }
 0x123   : > { %961 = vmatmul.mubr.bf16.vlgmr.msra.gmra.mrb[0].mxu1 %v717_v32  ;;  %2292 = vmatmul.mubr.bf16.gmra.mrb[32].mxu0 %v730_v34  ;;  %v782_v34 = vsub.s32 1, %v2764_v4 }
 0x124   : > { %968 = vmatprep.mubr.bf16.mxu1 %v723_v40  ;;  %2295 = vmatprep.mubr.msk.bf16.mxu0 %vm2478_vm0, %v2477_v1  ;;  %v643_v40 = vmul.f32 %v2936_v33, %v581_v25 }
 0x126   : > { %v721_v37 = vpack.c.bf16 %v643_v40, %v643_v40  ;;  %v1074_v40 = vsub.s32 2, %v2764_v4 }
 0x12b   : > { %969 = vmatmul.mubr.bf16.gmra.mrb[4].mxu1 %v718_v54  ;;  %2296 = vmatmul.mubr.bf16.gmra.mrb[36].mxu0 %v731_v26  ;;  %v2428_v54 = vld [vmem:[%s3374_s3 + $0x98] sm:$0xff]  }
 0x12c   : > { %976 = vmatprep.mubr.bf16.mxu1 %v724_v63  ;;  %2315 = vmatprep.mubr.msk.bf16.mxu0 %vm2478_vm0, %v2477_v1  ;;  %v2434_v63 = vld [vmem:[%s3374_s3 + $0xa8] sm:$0xff]  }
 0x12d   : > { %2306 = vmatpush3.bf16.msra.mxu0 %v2428_v54 }
 0x12e   : > { %2307 = vmatprep.subr.bf16.mxu0 %v2477_v1 }
 0x131   : > { %2308 = vmatpush3.bf16.msra.mxu0 %v2431_v58 }
 0x132   : > { %2309 = vmatprep.subr.bf16.mxu0 %v2477_v1 }
 0x133   : > { %977 = vmatmul.mubr.bf16.gmra.mrb[8].mxu1 %v719_v30  ;;  %v2429_v30 = vld [vmem:[%s3374_s3 + $0x40] sm:$0xff]  }
 0x134   : > { %984 = vmatprep.mubr.bf16.mxu1 %v725_v42  ;;  %2150 = vmatprep.subr.bf16.mxu1 %v2429_v30  ;;  %v2433_v42 = vld [vmem:[%s3374_s3 + $0x8] sm:$0xff]  }
 0x135   : > { %2310 = vmatpush3.bf16.msra.mxu0 %v2434_v63  ;;  %2151 = vmatpush3.bf16.msra.mxu1 %v2430_v38 }
 0x136   : > { %2311 = vmatprep.subr.bf16.mxu0 %v2477_v1  ;;  %2152 = vmatprep.subr.bf16.mxu1 %v2432_v41 }
 0x139   : > { %2312 = vmatpush3.bf16.msra.mxu0 %v2436_v39  ;;  %2153 = vmatpush3.bf16.msra.mxu1 %v2433_v42  ;;  %v3035_v39 = vrot.slane %v2772_v7, %v1074_v40 }
 0x13a   : > { %2313 = vmatprep.subr.bf16.mxu0 %v2477_v1  ;;  %2154 = vmatprep.subr.bf16.mxu1 %v2435_v44 }
 0x13b   : > { %985 = vmatmul.mubr.bf16.gmra.mrb[12].mxu1 %v720_v2  ;;  %v2448_v2 = vld [vmem:[%s3374_s3 + $0x38] sm:$0xff]  }
 0x13c   : > { %992 = vmatprep.mubr.bf16.mxu1 %v726_v28  ;;  %v3027_v28 = vrot.slane %v2772_v7, %v782_v34 }
 0x13d   : > { %2314 = vmatpush3.bf16.msra.mxu0 %v2438_v43  ;;  %2155 = vmatpush3.bf16.msra.mxu1 %v2437_v45  ;;  %v3038_v43 = vrot.slane %v2772_v7, %v1087_v50 }
 0x13e   : > { %2156 = vmatprep.subr.bf16.mxu1 %v2439_v51 }
 0x141   : > { %2157 = vmatpush3.bf16.msra.mxu1 %v2440_v53 }
 0x142   : > { %2158 = vmatprep.subr.bf16.mxu1 %v2441_v56 }
 0x143   : > { %993 = vmatmul.mubr.bf16.gmra.mrb[16].mxu1 %v721_v37 }
 0x145   : > { %2159 = vmatpush3.bf16.msra.mxu1 %v2442_v57 }
 0x146   : > { %2160 = vmatprep.subr.bf16.mxu1 %v2443_v59 }
 0x149   : > { %2161 = vmatpush3.bf16.msra.mxu1 %v2444_v61 }
 0x14a   : > { %2162 = vmatprep.subr.bf16.mxu1 %v2445_v62 }
 0x14d   : > { %2163 = vmatpush3.bf16.msra.mxu1 %v2446_v0 }
 0x14e   : > { %2164 = vmatprep.subr.bf16.mxu1 %v2447_v60 }
 0x151   : > { %2165 = vmatpush3.bf16.msra.mxu1 %v2448_v2 }
 0x152   : > { %2335 = vmatprep.subr.bf16.mxu1 %v2477_v1 }
 0x1de   : > { %v1034_v3 = vpop.f32.mrb[20].mxu0 }
 0x1df   : > { %v2281_v11 = vpop.f32.mrb[21].mxu0 }
 0x1e0   : > { %v1037_v14 = vpop.f32.mrb[22].mxu0 }
 0x1e1   : > { %v2282_v20 = vpop.f32.mrb[23].mxu0 }
 0x1e6   : > { %v1042_v9 = vpop.f32.mrb[24].mxu0 }
 0x1e7   : > { %v2285_v21 = vpop.f32.mrb[25].mxu0 }
 0x1e8   : > { %v1045_v25 = vpop.f32.mrb[26].mxu0 }
 0x1e9   : > { %v2286_v27 = vpop.f32.mrb[27].mxu0 }
 0x1ee   : > { %v3019_v29 = vpop.f32.mrb[28].mxu0 }
 0x1ef   : > { %v2289_v31 = vpop.f32.mrb[29].mxu0 }
 0x1f0   : > { %v3021_v18 = vpop.f32.mrb[30].mxu0 }
 0x1f1   : > { %v2290_v32 = vpop.f32.mrb[31].mxu0 }
 0x1f6   : > { %v2107_v19 = vpop.f32.mrb[0].mxu1  ;;  %v3024_v26 = vpop.f32.mrb[32].mxu0 }
 0x1f7   : > { %v2108_v37 = vpop.f32.mrb[1].mxu1  ;;  %v2293_v48 = vpop.f32.mrb[33].mxu0 }
 0x1f8   : > { %v2109_v49 = vadd.f32 %v2108_v37, %v2107_v19  ;;  %v2110_v54 = vpop.f32.mrb[2].mxu1  ;;  %v3031_v58 = vpop.f32.mrb[34].mxu0 }
 0x1f9   : > { %v2111_v63 = vpop.f32.mrb[3].mxu1  ;;  %v2294_v30 = vpop.f32.mrb[35].mxu0 }
 0x1fa   : > { %v963_v38 = vadd.f32 %v2109_v49, %v3027_v28  ;;  %v2112_v41 = vadd.f32 %v2111_v63, %v2110_v54 }
 0x1fc   : > { %v1035_v42 = vadd.f32 %v1034_v3, %v963_v38  ;;  %v966_v44 = vadd.f32 %v2112_v41, %v3027_v28 }
 0x1fe   : > { %v1076_v45 = vmul.f32 %v3035_v39, %v1035_v42  ;;  %v1038_v51 = vadd.f32 %v1037_v14, %v966_v44  ;;  %v2113_v53 = vpop.f32.mrb[4].mxu1  ;;  %v3042_v56 = vpop.f32.mrb[36].mxu0 }
 0x1ff   : > { %v2114_v57 = vpop.f32.mrb[5].mxu1  ;;  %v2297_v59 = vpop.f32.mrb[37].mxu0 }
 0x200   : > { %v1089_v61 = vadd.f32 %v3038_v43, %v1076_v45  ;;  %v1077_v62 = vmul.f32 %v3035_v39, %v1038_v51  ;;  %v2115_v0 = vadd.f32 %v2114_v57, %v2113_v53  ;;  %v2116_v60 = vpop.f32.mrb[6].mxu1  ;;  %v1069_v2 = vpop.f32.mrb[38].mxu0 }
 0x201   : > { %v2117_v3 = vpop.f32.mrb[7].mxu1  ;;  %v2298_v11 = vpop.f32.mrb[39].mxu0 }
 0x202   : > { %v1090_v20 = vadd.f32 %v3038_v43, %v1077_v62  ;;  %v971_v21 = vadd.f32 %v2115_v0, %v3027_v28  ;;  %v2118_v27 = vadd.f32 %v2117_v3, %v2116_v60  ;;  %v3048_v14 = vmax.f32 %v1089_v61, 0.0 }
 0x204   : > { %v1043_v31 = vadd.f32 %v1042_v9, %v971_v21  ;;  %v974_v32 = vadd.f32 %v2118_v27, %v3027_v28  ;;  %v1099_v34 = vmax.f32 %v1090_v20, 0.0  ;;  %v1134_v19 = vrot.slane %v3048_v14, 1 }
 0x205   : > { %v1107_v63 = vrot.slane %v3048_v14, 7 }
 0x206   : > { %v1078_v40 = vmul.f32 %v3035_v39, %v1043_v31  ;;  %v1046_v37 = vadd.f32 %v1045_v25, %v974_v32  ;;  %v2119_v48 = vpop.f32.mrb[8].mxu1  ;;  %v1108_v49 = vrot.slane %v1099_v34, 7  ;;  %v1135_v50 = vrot.slane %v1099_v34, 1 }
 0x207   : > { %v2120_v54 = vpop.f32.mrb[9].mxu1  ;;  %v1166_v30 = vpack.c.bf16 %v1099_v34, %v3048_v14 }
 0x208   : > { %v1091_v38 = vadd.f32 %v3038_v43, %v1078_v40  ;;  %v1079_v9 = vmul.f32 %v3035_v39, %v1046_v37  ;;  %v2121_v41 = vadd.f32 %v2120_v54, %v2119_v48  ;;  %v2122_v42 = vpop.f32.mrb[10].mxu1  ;;  %v1150_v44 = vsel %vm653_vm1, %v1134_v19, %v1135_v50 }
 0x209   : > { %1404 = vmatprep.mubr.bf16.mxu1 %v1166_v30  ;;  %v2123_v25 = vpop.f32.mrb[11].mxu1  ;;  %v3065_v45 = vsel %vm580_vm2, %v1107_v63, %v1108_v49  ;;  %v1152_v2 = vmul.f32 %v1150_v44, %v2774_v8 }
 0x20a   : > { %v3067_v51 = vmax.f32 %v1091_v38, 0.0  ;;  %v1092_v53 = vadd.f32 %v3038_v43, %v1079_v9  ;;  %v979_v57 = vadd.f32 %v2121_v41, %v3027_v28  ;;  %v2124_v59 = vadd.f32 %v2123_v25, %v2122_v42 }
 0x20c   : > { %v1136_v61 = vrot.slane %v3067_v51, 1  ;;  %v3072_v62 = vmax.f32 %v1092_v53, 0.0  ;;  %v1051_v0 = vadd.f32 %v3019_v29, %v979_v57  ;;  %v982_v60 = vadd.f32 %v2124_v59, %v3027_v28 }
 0x20d   : > { %v1109_v3 = vrot.slane %v3067_v51, 7 }
 0x20e   : > { %v1080_v11 = vmul.f32 %v3035_v39, %v1051_v0  ;;  %v1054_v20 = vadd.f32 %v3021_v18, %v982_v60  ;;  %v2125_v21 = vpop.f32.mrb[12].mxu1  ;;  %v1149_v27 = vsel %vm653_vm1, %v1135_v50, %v1136_v61  ;;  %v1137_v31 = vrot.slane %v3072_v62, 1 }
 0x20f   : > { %v2126_v32 = vpop.f32.mrb[13].mxu1  ;;  %v1153_v34 = vmul.f32 %v1149_v27, %v2783_v12  ;;  %v1167_v29 = vpack.c.bf16 %v3072_v62, %v3067_v51  ;;  %v1110_v8 = vrot.slane %v3072_v62, 7  ;;  %v1122_v40 = vsel %vm580_vm2, %v1108_v49, %v1109_v3  ;;  %v2453_v51 = vld [vmem:[%s3375_s4 + $0x20] sm:$0xff]   ;;  %v2454_v62 = vld [vmem:[%s3375_s4 + $0x28] sm:$0xff]  }
 0x210   : > { %v1093_v37 = vadd.f32 %v3038_v43, %v1080_v11  ;;  %v1081_v18 = vmul.f32 %v3035_v39, %v1054_v20  ;;  %v2127_v48 = vadd.f32 %v2126_v32, %v2125_v21  ;;  %v2128_v54 = vpop.f32.mrb[14].mxu1  ;;  %v1148_v50 = vsel %vm653_vm1, %v1136_v61, %v1137_v31 }
 0x211   : > { %v2129_v30 = vpop.f32.mrb[15].mxu1  ;;  %v1171_v38 = vpack.c.bf16 %v1153_v34, %v1152_v2  ;;  %v1121_v12 = vsel %vm580_vm2, %v1109_v3, %v1110_v8  ;;  %v3100_v44 = vmul.f32 %v1122_v40, %v2794_v23  ;;  %v1154_v0 = vmul.f32 %v1148_v50, %v2816_v35 }
 0x212   : > { %v3095_v9 = vmax.f32 %v1093_v37, 0.0  ;;  %v1094_v41 = vadd.f32 %v3038_v43, %v1081_v18  ;;  %v987_v49 = vadd.f32 %v2127_v48, %v3027_v28  ;;  %v2130_v42 = vadd.f32 %v2129_v30, %v2128_v54 }
 0x213   : > { %2316 = vmatmul.mubr.bf16.vlgmr.msra.gmra.mrb[40].mxu0 %v1171_v38  ;;  %v3103_v25 = vmul.f32 %v1121_v12, %v2796_v24 }
 0x214   : > { %v3105_v53 = vmax.f32 %v1094_v41, 0.0  ;;  %v1059_v57 = vadd.f32 %v3024_v26, %v987_v49  ;;  %v990_v59 = vadd.f32 %v2130_v42, %v3027_v28  ;;  %2319 = vmatprep.mubr.msk.bf16.mxu0 %vm2478_vm0, %v2477_v1  ;;  %v1138_v61 = vrot.slane %v3095_v9, 1 }
 0x215   : > { %v1162_v23 = vpack.c.bf16 %v3103_v25, %v3100_v44  ;;  %v1111_v60 = vrot.slane %v3095_v9, 7  ;;  %v2456_v44 = vld [vmem:[%s3375_s4 + $0x38] sm:$0xff]  }
 0x216   : > { %v1082_v24 = vmul.f32 %v3035_v39, %v1059_v57  ;;  %v1062_v2 = vadd.f32 %v3031_v58, %v990_v59  ;;  %v2131_v3 = vpop.f32.mrb[16].mxu1  ;;  %v1147_v26 = vsel %vm653_vm1, %v1137_v31, %v1138_v61  ;;  %v1139_v11 = vrot.slane %v3105_v53, 1 }
 0x217   : > { %v2132_v20 = vpop.f32.mrb[17].mxu1  ;;  %v1155_v21 = vmul.f32 %v1147_v26, %v2818_v36  ;;  %v1168_v35 = vpack.c.bf16 %v3105_v53, %v3095_v9  ;;  %v1112_v27 = vrot.slane %v3105_v53, 7  ;;  %v1120_v32 = vsel %vm580_vm2, %v1110_v8, %v1111_v60 }
 0x218   : > { %v1095_v34 = vadd.f32 %v3038_v43, %v1082_v24  ;;  %v1083_v58 = vmul.f32 %v3035_v39, %v1062_v2  ;;  %v2133_v40 = vadd.f32 %v2132_v20, %v2131_v3  ;;  %v2134_v37 = vpop.f32.mrb[18].mxu1  ;;  %v1146_v31 = vsel %vm653_vm1, %v1138_v61, %v1139_v11 }
 0x219   : > { %v2135_v18 = vpop.f32.mrb[19].mxu1  ;;  %v1172_v48 = vpack.c.bf16 %v1155_v21, %v1154_v0  ;;  %v1119_v36 = vsel %vm580_vm2, %v1111_v60, %v1112_v27  ;;  %v1129_v54 = vmul.f32 %v1120_v32, %v2843_v52 }
 0x21a   : > { %v1104_v50 = vmax.f32 %v1095_v34, 0.0  ;;  %v1096_v30 = vadd.f32 %v3038_v43, %v1083_v58  ;;  %v995_v8 = vadd.f32 %v2133_v40, %v3027_v28  ;;  %v1130_v38 = vmul.f32 %v1119_v36, %v2847_v55 }
 0x21b   : > { %2320 = vmatmul.mubr.bf16.gmra.mrb[44].mxu0 %v1172_v48  ;;  %v1156_v28 = vmul.f32 %v1146_v31, %v2870_v15 }
 0x21c   : > { %v1105_v12 = vmax.f32 %v1096_v30, 0.0  ;;  %v1067_v9 = vadd.f32 %v3042_v56, %v995_v8  ;;  %2323 = vmatprep.mubr.msk.bf16.mxu0 %vm2478_vm0, %v2477_v1  ;;  %v1140_v41 = vrot.slane %v1104_v50, 1  ;;  %v1163_v49 = vpack.c.bf16 %v1130_v38, %v1129_v54 }
 0x21d   : > { %v1113_v42 = vrot.slane %v1104_v50, 7  ;;  %v1226_v8 = vsub.s32 4, %v2764_v4 }
 0x21e   : > { %v1084_v53 = vmul.f32 %v3035_v39, %v1067_v9  ;;  %v1145_v52 = vsel %vm653_vm1, %v1139_v11, %v1140_v41  ;;  %v1141_v57 = vrot.slane %v1105_v12, 1  ;;  %v1169_v59 = vpack.c.bf16 %v1105_v12, %v1104_v50 }
 0x21f   : > { %v1157_v55 = vmul.f32 %v1145_v52, %v2874_v22  ;;  %v1114_v61 = vrot.slane %v1105_v12, 7  ;;  %v1118_v56 = vsel %vm580_vm2, %v1112_v27, %v1113_v42  ;;  %v1126_v27 = vmul.f32 %v3065_v45, %v2781_v10  ;;  %v2452_v45 = vld [vmem:[%s3375_s4 + $0x18] sm:$0xff]  }
 0x220   : > { %v1097_v0 = vadd.f32 %v3038_v43, %v1084_v53  ;;  %v1144_v60 = vsel %vm653_vm1, %v1140_v41, %v1141_v57  ;;  %v1131_v3 = vmul.f32 %v1118_v56, %v2886_v46  ;;  %v3221_v9 = vrot.slane %v2772_v7, %v1226_v8 }
 0x221   : > { %v1173_v24 = vpack.c.bf16 %v1157_v55, %v1156_v28  ;;  %v1117_v39 = vsel %vm580_vm2, %v1113_v42, %v1114_v61  ;;  %v1158_v32 = vmul.f32 %v1144_v60, %v2899_v16 }
 0x222   : > { %v1106_v2 = vmax.f32 %v1097_v0, 0.0  ;;  %v1132_v15 = vmul.f32 %v1117_v39, %v2888_v47 }
 0x223   : > { %2324 = vmatmul.mubr.bf16.gmra.mrb[48].mxu0 %v1173_v24 }
 0x224   : > { %v1115_v22 = vrot.slane %v1106_v2, 7  ;;  %2327 = vmatprep.mubr.msk.bf16.mxu0 %vm2478_vm0, %v2477_v1  ;;  %v1142_v26 = vrot.slane %v1106_v2, 1  ;;  %v1164_v11 = vpack.c.bf16 %v1132_v15, %v1131_v3  ;;  %v1170_v10 = vpack.c.bf16 %v1106_v2, %v1106_v2 }
 0x225   : > { %v1531_v3 = vsub.s32 6, %v2764_v4 }
 0x226   : > { %v1124_v43 = vsel %vm580_vm2, %v1115_v22, %v1107_v63  ;;  %v1143_v20 = vsel %vm653_vm1, %v1141_v57, %v1142_v26  ;;  %v1151_v46 = vsel %vm653_vm1, %v1142_v26, %v1134_v19  ;;  %v1116_v47 = vsel %vm580_vm2, %v1114_v61, %v1115_v22  ;;  %v2450_v19 = vld [vmem:[%s3375_s4 + $0x8] sm:$0xff]  }
 0x227   : > { %v1125_v21 = vmul.f32 %v1124_v43, %v2767_v6  ;;  %v1159_v63 = vmul.f32 %v1143_v20, %v2901_v17  ;;  %v1160_v6 = vmul.f32 %v1151_v46, %v2920_v13  ;;  %v1133_v16 = vmul.f32 %v1116_v47, %v2936_v33  ;;  %v2449_v13 = vld [vmem:[%s3375_s4] sm:$0xff]   ;;  %v2451_v33 = vld [vmem:[%s3375_s4 + $0x10] sm:$0xff]  }
 0x228   : > { %v1518_v61 = vsub.s32 5, %v2764_v4 }
 0x229   : > { %v1161_v34 = vpack.c.bf16 %v1126_v27, %v1125_v21  ;;  %v1174_v58 = vpack.c.bf16 %v1159_v63, %v1158_v32  ;;  %v1175_v14 = vpack.c.bf16 %v1160_v6, %v1160_v6  ;;  %v1165_v17 = vpack.c.bf16 %v1133_v16, %v1133_v16 }
 0x22a   : > { %v3231_v2 = vrot.slane %v2772_v7, %v1518_v61  ;;  %v3238_v63 = vrot.slane %v2772_v7, %v1531_v3 }
 0x22b   : > { %1405 = vmatmul.mubr.bf16.vlgmr.msra.gmra.mrb[20].mxu1 %v1161_v34  ;;  %2328 = vmatmul.mubr.bf16.gmra.mrb[52].mxu0 %v1174_v58 }
 0x22c   : > { %1412 = vmatprep.mubr.bf16.mxu1 %v1167_v29  ;;  %2331 = vmatprep.mubr.msk.bf16.mxu0 %vm2478_vm0, %v2477_v1  ;;  %v2455_v29 = vld [vmem:[%s3375_s4 + $0x30] sm:$0xff]  }
 0x22d   : > { %2336 = vmatpush3.bf16.msra.mxu1 %v2449_v13 }
 0x22e   : > { %2337 = vmatprep.subr.bf16.mxu1 %v2477_v1 }
 0x231   : > { %2338 = vmatpush3.bf16.msra.mxu1 %v2450_v19  ;;  %v1554_v19 = vpop.permute.xlu0 %1553 }
 0x232   : > { %2339 = vmatprep.subr.bf16.mxu1 %v2477_v1 }
 0x233   : > { %1413 = vmatmul.mubr.bf16.gmra.mrb[24].mxu1 %v1162_v23  ;;  %2332 = vmatmul.mubr.bf16.gmra.mrb[56].mxu0 %v1175_v14 }
 0x234   : > { %1420 = vmatprep.mubr.bf16.mxu1 %v1168_v35 }
 0x235   : > { %2340 = vmatpush3.bf16.msra.mxu1 %v2451_v33 }
 0x236   : > { %2341 = vmatprep.subr.bf16.mxu1 %v2477_v1 }
 0x239   : > { %2342 = vmatpush3.bf16.msra.mxu1 %v2452_v45 }
 0x23a   : > { %2343 = vmatprep.subr.bf16.mxu1 %v2477_v1 }
 0x23b   : > { %1421 = vmatmul.mubr.bf16.gmra.mrb[28].mxu1 %v1163_v49 }
 0x23c   : > { %1428 = vmatprep.mubr.bf16.mxu1 %v1169_v59 }
 0x23d   : > { %2344 = vmatpush3.bf16.msra.mxu1 %v2453_v51 }
 0x23e   : > { %2345 = vmatprep.subr.bf16.mxu1 %v2477_v1 }
 0x241   : > { %2346 = vmatpush3.bf16.msra.mxu1 %v2454_v62 }
 0x242   : > { %2347 = vmatprep.subr.bf16.mxu1 %v2477_v1 }
 0x243   : > { %1429 = vmatmul.mubr.bf16.gmra.mrb[32].mxu1 %v1164_v11 }
 0x244   : > { %1436 = vmatprep.mubr.bf16.mxu1 %v1170_v10 }
 0x245   : > { %2348 = vmatpush3.bf16.msra.mxu1 %v2455_v29 }
 0x246   : > { %2349 = vmatprep.subr.bf16.mxu1 %v2477_v1 }
 0x249   : > { %2350 = vmatpush3.bf16.msra.mxu1 %v2456_v44 }
 0x24a   : > { %2355 = vmatprep.subr.bf16.mxu1 %v2477_v1 }
 0x24b   : > { %1437 = vmatmul.mubr.bf16.gmra.mrb[36].mxu1 %v1165_v17 }
 0x24c   : > { %2351 = vmatprep.mubr.msk.bf16.mxu1 %vm2478_vm0, %v2477_v1 }
 0x2e6   : > { %v1478_v25 = vpop.f32.mrb[40].mxu0 }
 0x2e7   : > { %v2317_v23 = vpop.f32.mrb[41].mxu0 }
 0x2e8   : > { %v1481_v35 = vpop.f32.mrb[42].mxu0 }
 0x2e9   : > { %v2318_v40 = vpop.f32.mrb[43].mxu0 }
 0x2ee   : > { %v1486_v37 = vpop.f32.mrb[44].mxu0 }
 0x2ef   : > { %v2321_v31 = vpop.f32.mrb[45].mxu0 }
 0x2f0   : > { %v1489_v18 = vpop.f32.mrb[46].mxu0 }
 0x2f1   : > { %v2322_v48 = vpop.f32.mrb[47].mxu0 }
 0x2f6   : > { %v1494_v36 = vpop.f32.mrb[48].mxu0 }
 0x2f7   : > { %v2325_v54 = vpop.f32.mrb[49].mxu0 }
 0x2f8   : > { %v1497_v50 = vpop.f32.mrb[50].mxu0  ;;  %v1564_v54 = vpop.permute.xlu0 %1563 }
 0x2f9   : > { %v2326_v30 = vpop.f32.mrb[51].mxu0 }
 0x2fe   : > { %v2166_v38 = vpop.f32.mrb[20].mxu1  ;;  %v3218_v12 = vpop.f32.mrb[52].mxu0 }
 0x2ff   : > { %v2167_v41 = vpop.f32.mrb[21].mxu1  ;;  %v2329_v49 = vpop.f32.mrb[53].mxu0 }
 0x300   : > { %v2168_v42 = vadd.f32 %v2167_v41, %v2166_v38  ;;  %v2169_v53 = vpop.f32.mrb[22].mxu1  ;;  %v3223_v52 = vpop.f32.mrb[54].mxu0 }
 0x301   : > { %v2170_v57 = vpop.f32.mrb[23].mxu1  ;;  %v2330_v59 = vpop.f32.mrb[55].mxu0 }
 0x302   : > { %v1407_v28 = vadd.f32 %v2168_v42, %v3221_v9  ;;  %v2171_v55 = vadd.f32 %v2170_v57, %v2169_v53 }
 0x304   : > { %v1479_v56 = vadd.f32 %v1478_v25, %v1407_v28  ;;  %v1410_v0 = vadd.f32 %v2171_v55, %v3221_v9 }
 0x306   : > { %v1482_v60 = vadd.f32 %v1481_v35, %v1410_v0  ;;  %v2172_v24 = vpop.f32.mrb[24].mxu1  ;;  %v3228_v39 = vpop.f32.mrb[56].mxu0  ;;  %v1520_v32 = vmul.f32 %v3231_v2, %v1479_v56 }
 0x307   : > { %v2173_v15 = vpop.f32.mrb[25].mxu1  ;;  %v2333_v22 = vpop.f32.mrb[57].mxu0 }
 0x308   : > { %v2174_v26 = vadd.f32 %v2173_v15, %v2172_v24  ;;  %v2175_v11 = vpop.f32.mrb[26].mxu1  ;;  %v1513_v43 = vpop.f32.mrb[58].mxu0  ;;  %v1521_v20 = vmul.f32 %v3231_v2, %v1482_v60  ;;  %v3246_v17 = vadd.f32 %v3238_v63, %v1520_v32 }
 0x309   : > { %v2176_v46 = vpop.f32.mrb[27].mxu1  ;;  %v2334_v47 = vpop.f32.mrb[59].mxu0 }
 0x30a   : > { %v1415_v21 = vadd.f32 %v2174_v26, %v3221_v9  ;;  %v2177_v27 = vadd.f32 %v2176_v46, %v2175_v11  ;;  %v3242_v6 = vadd.f32 %v3238_v63, %v1521_v20  ;;  %v1542_v23 = vmax.f32 %v3246_v17, 0.0  ;;  %v1574_v22 = vpop.permute.xlu0 %1573 }
 0x30c   : > { %v1487_v34 = vadd.f32 %v1486_v37, %v1415_v21  ;;  %v1418_v58 = vadd.f32 %v2177_v27, %v3221_v9  ;;  %v1543_v62 = vmax.f32 %v3242_v6, 0.0  ;;  %v1559_v37 = vpop.permute.xlu1 %1558  ;;  %v1596_v41 = vmul.f32 %v1554_v19, %v1542_v23 }
 0x30e   : > { %v1522_v14 = vmul.f32 %v3231_v2, %v1487_v34  ;;  %v1490_v10 = vadd.f32 %v1489_v18, %v1418_v58  ;;  %v2178_v16 = vpop.f32.mrb[28].mxu1  ;;  %v1597_v48 = vmul.f32 %v1559_v37, %v1543_v62 }
 0x30f   : > { %v2179_v13 = vpop.f32.mrb[29].mxu1 }
 0x310   : > { %v3249_v33 = vadd.f32 %v3238_v63, %v1522_v14  ;;  %v1523_v7 = vmul.f32 %v3231_v2, %v1490_v10  ;;  %v2180_v45 = vadd.f32 %v2179_v13, %v2178_v16  ;;  %v2181_v51 = vpop.f32.mrb[30].mxu1  ;;  %v1605_v55 = vadd.f32 %v1597_v48, %v1596_v41 }
 0x311   : > { %v2182_v29 = vpop.f32.mrb[31].mxu1 }
 0x312   : > { %v1423_v44 = vadd.f32 %v2180_v45, %v3221_v9  ;;  %v2183_v25 = vadd.f32 %v2182_v29, %v2181_v51  ;;  %v1544_v35 = vmax.f32 %v3249_v33, 0.0  ;;  %v3257_v40 = vadd.f32 %v3238_v63, %v1523_v7  ;;  %v1584_v51 = vpop.permute.xlu0 %1583 }
 0x314   : > { %v1495_v31 = vadd.f32 %v1494_v36, %v1423_v44  ;;  %v1426_v18 = vadd.f32 %v2183_v25, %v3221_v9  ;;  %v1598_v49 = vmul.f32 %v1564_v54, %v1544_v35  ;;  %v1545_v42 = vmax.f32 %v3257_v40, 0.0 }
 0x316   : > { %v1524_v30 = vmul.f32 %v3231_v2, %v1495_v31  ;;  %v1498_v8 = vadd.f32 %v1497_v50, %v1426_v18  ;;  %v2184_v38 = vpop.f32.mrb[32].mxu1  ;;  %v1569_v50 = vpop.permute.xlu1 %1568  ;;  %v1606_v3 = vadd.f32 %v1605_v55, %v1598_v49 }
 0x317   : > { %v2185_v53 = vpop.f32.mrb[33].mxu1  ;;  %v1599_v15 = vmul.f32 %v1569_v50, %v1545_v42  ;;  %v2458_v50 = vld [vmem:[%s3376_s5 + $0x8] sm:$0xff]  }
 0x318   : > { %v3269_v36 = vadd.f32 %v3238_v63, %v1524_v30  ;;  %v1525_v57 = vmul.f32 %v3231_v2, %v1498_v8  ;;  %v2186_v59 = vadd.f32 %v2185_v53, %v2184_v38  ;;  %v2187_v28 = vpop.f32.mrb[34].mxu1  ;;  %v1594_v8 = vpop.permute.xlu0 %1593 }
 0x319   : > { %v2188_v61 = vpop.f32.mrb[35].mxu1  ;;  %v1607_v27 = vadd.f32 %v1606_v3, %v1599_v15  ;;  %v2461_v3 = vld [vmem:[%s3376_s5 + $0x20] sm:$0xff]   ;;  %v2462_v15 = vld [vmem:[%s3376_s5 + $0x28] sm:$0xff]  }
 0x31a   : > { %v1546_v56 = vmax.f32 %v3269_v36, 0.0  ;;  %v3274_v0 = vadd.f32 %v3238_v63, %v1525_v57  ;;  %v1431_v60 = vadd.f32 %v2186_v59, %v3221_v9  ;;  %v2189_v24 = vadd.f32 %v2188_v61, %v2187_v28  ;;  %v1579_v10 = vpop.permute.xlu1 %1578 }
 0x31c   : > { %v1503_v26 = vadd.f32 %v3218_v12, %v1431_v60  ;;  %v1434_v11 = vadd.f32 %v2189_v24, %v3221_v9  ;;  %v1600_v43 = vmul.f32 %v1574_v22, %v1546_v56  ;;  %v1547_v20 = vmax.f32 %v3274_v0, 0.0  ;;  %v2459_v60 = vld [vmem:[%s3376_s5 + $0x10] sm:$0xff]   ;;  %v2460_v24 = vld [vmem:[%s3376_s5 + $0x18] sm:$0xff]  }
 0x31d   : > { %v2463_v22 = vld [vmem:[%s3376_s5 + $0x30] sm:$0xff]  }
 0x31e   : > { %v1526_v46 = vmul.f32 %v3231_v2, %v1503_v26  ;;  %v1506_v47 = vadd.f32 %v3223_v52, %v1434_v11  ;;  %v2190_v21 = vpop.f32.mrb[36].mxu1  ;;  %v1608_v16 = vadd.f32 %v1607_v27, %v1600_v43  ;;  %v1601_v19 = vmul.f32 %v1579_v10, %v1547_v20  ;;  %v1589_v18 = vpop.permute.xlu1 %1588  ;;  %v2464_v26 = vld [vmem:[%s3376_s5 + $0x38] sm:$0xff]  }
 0x31f   : > { %v2191_v32 = vpop.f32.mrb[37].mxu1 }
 0x320   : > { %v3287_v34 = vadd.f32 %v3238_v63, %v1526_v46  ;;  %v1527_v58 = vmul.f32 %v3231_v2, %v1506_v47  ;;  %v2192_v12 = vadd.f32 %v2191_v32, %v2190_v21  ;;  %v2193_v14 = vpop.f32.mrb[38].mxu1  ;;  %v1609_v37 = vadd.f32 %v1608_v16, %v1601_v19 }
 0x321   : > { %v2194_v13 = vpop.f32.mrb[39].mxu1 }
 0x322   : > { %v1548_v7 = vmax.f32 %v3287_v34, 0.0  ;;  %v3294_v52 = vadd.f32 %v3238_v63, %v1527_v58  ;;  %v1439_v45 = vadd.f32 %v2192_v12, %v3221_v9 }
 0x324   : > { %v1602_v29 = vmul.f32 %v1584_v51, %v1548_v7  ;;  %v1549_v44 = vmax.f32 %v3294_v52, 0.0  ;;  %v1511_v25 = vadd.f32 %v3228_v39, %v1439_v45 }
 0x326   : > { %v1528_v31 = vmul.f32 %v3231_v2, %v1511_v25  ;;  %v1610_v48 = vadd.f32 %v1609_v37, %v1602_v29  ;;  %v1603_v54 = vmul.f32 %v1589_v18, %v1549_v44 }
 0x328   : > { %v3305_v30 = vadd.f32 %v3238_v63, %v1528_v31  ;;  %v1611_v38 = vadd.f32 %v1610_v48, %v1603_v54  ;;  %v2457_v63 = vld [vmem:[%s3376_s5] sm:$0xff]  }
 0x32a   : > { %v1550_v9 = vmax.f32 %v3305_v30, 0.0 }
 0x32c   : > { %v1604_v41 = vmul.f32 %v1594_v8, %v1550_v9 }
 0x32e   : > { %v1612_v49 = vadd.f32 %v1611_v38, %v1604_v41 }
 0x330   : > { %v1613_v39 = vrot.slane %v1612_v49, 4 }
 0x332   : > { %v1614_v53 = vadd.f32 %v1613_v39, %v1612_v49 }
 0x334   : > { %v1615_v57 = vrot.slane %v1614_v53, 2 }
 0x336   : > { %v1616_v2 = vadd.f32 %v1615_v57, %v1614_v53 }
 0x338   : > { %v1617_v59 = vrot.slane %v1616_v2, 1 }
 0x33a   : > { %v1618_v28 = vadd.f32 %v1617_v59, %v1616_v2 }
 0x33c   : > { %v1619_v55 = vmul.f32 0.014705882, %v1618_v28 }
 0x33e   : > { %v1620_v61 = vpack.c.bf16 %v1619_v55, %v1619_v55 }
 0x340   : > { %2352 = vmatmul.mubr.bf16.vlgmr.msra.gmra.mrb[40].mxu1 %v1620_v61 }
 0x341   : > { %2356 = vmatpush3.bf16.msra.mxu1 %v2457_v63  ;;  %2371 = vmatprep.mubr.msk.bf16.mxu1 %vm2478_vm0, %v2477_v1 }
 0x342   : > { %2357 = vmatprep.subr.bf16.mxu1 %v2477_v1 }
 0x345   : > { %2358 = vmatpush3.bf16.msra.mxu1 %v2458_v50 }
 0x346   : > { %2359 = vmatprep.subr.bf16.mxu1 %v2477_v1 }
 0x349   : > { %2360 = vmatpush3.bf16.msra.mxu1 %v2459_v60 }
 0x34a   : > { %2361 = vmatprep.subr.bf16.mxu1 %v2477_v1 }
 0x34d   : > { %2362 = vmatpush3.bf16.msra.mxu1 %v2460_v24 }
 0x34e   : > { %2363 = vmatprep.subr.bf16.mxu1 %v2477_v1 }
 0x351   : > { %2364 = vmatpush3.bf16.msra.mxu1 %v2461_v3 }
 0x352   : > { %2365 = vmatprep.subr.bf16.mxu1 %v2477_v1 }
 0x355   : > { %2366 = vmatpush3.bf16.msra.mxu1 %v2462_v15 }
 0x356   : > { %2367 = vmatprep.subr.bf16.mxu1 %v2477_v1 }
 0x359   : > { %2368 = vmatpush3.bf16.msra.mxu1 %v2463_v22 }
 0x35a   : > { %2369 = vmatprep.subr.bf16.mxu1 %v2477_v1 }
 0x35d   : > { %2370 = vmatpush3.bf16.msra.mxu1 %v2464_v26 }
 0x413   : > { %v1719_v11 = vpop.f32.mrb[40].mxu1 }
 0x414   : > { %v1725_v43 = vmax.f32 %v1719_v11, 0.0  ;;  %v2353_v46 = vpop.f32.mrb[41].mxu1 }
 0x415   : > { %v1722_v47 = vpop.f32.mrb[42].mxu1 }
 0x416   : > { %v1726_v21 = vpack.c.bf16 %v1725_v43, %v1725_v43  ;;  %v2354_v27 = vpop.f32.mrb[43].mxu1 }
 0x418   : > { %2372 = vmatmul.mubr.bf16.vlgmr.msra.gmra.mrb[44].mxu1 %v1726_v21 }
 0x4eb   : > { %v1825_v32 = vpop.f32.mrb[44].mxu1 }
 0x4ec   : > { %v1831_v58 = vsub.f32 0.0, %v1825_v32  ;;  %v2373_v12 = vpop.f32.mrb[45].mxu1 }
 0x4ed   : > { %v1828_v14 = vpop.f32.mrb[46].mxu1 }
 0x4ee   : > { %v1832_v10 = vmul.f32 1.442695, %v1831_v58  ;;  %v2374_v16 = vpop.f32.mrb[47].mxu1 }
 0x4f0   : > { %2465 = vpow2.f32 %v1832_v10 }
 0x4fa   : > { %v2466_v1 = vpop.eup %2465 }
 0x4fb   : > { %v1834_v13 = vadd.f32 1.0, %v2466_v1 }
 0x4fd   : > { %2467 = vrcp.f32 %v1834_v13 }
 0x507   : > { %v2468_v19 = vpop.eup %2467 }
 0x508   : > { %v1839_v45 = vrot.slane %v2468_v19, %v419_v5 }
 0x50a   : > { %v1840_v51 = vmul.f32 %v1839_v45, %v1542_v23  ;;  %v1841_v29 = vmul.f32 %v1839_v45, %v1543_v62  ;;  %v1842_v25 = vmul.f32 %v1839_v45, %v1544_v35  ;;  %v1843_v37 = vmul.f32 %v1839_v45, %v1545_v42 }
 0x50b   : > { %v1844_v4 = vmul.f32 %v1839_v45, %v1546_v56  ;;  %v1845_v5 = vmul.f32 %v1839_v45, %v1547_v20  ;;  %v1846_v6 = vmul.f32 %v1839_v45, %v1548_v7  ;;  %v1847_v17 = vmul.f32 %v1839_v45, %v1549_v44 }
 0x50c   : > { %v1848_v33 = vmul.f32 %v1839_v45, %v1550_v9  ;;  %v2058_v62 = vpack.c.bf16 %v1841_v29, %v1840_v51  ;;  %v2063_v23 = vpack.c.bf16 %v1843_v37, %v1842_v25 }
 0x50d   : > { %v2068_v35 = vpack.c.bf16 %v1845_v5, %v1844_v4  ;;  %v2073_v40 = vpack.c.bf16 %v1847_v17, %v1846_v6 }
 0x50e   : > { %v2054_v42 = vpack.c.bf16 %v1848_v33, %v1848_v33  ;;  %2059 = vst [vmem:[%s361_s21] sm:$0xff] %v2058_v62   ;;  %2075 = vst [vmem:[%s361_s21 + $0x8] sm:$0xff] %v2063_v23  }
 0x50f   : > { %2076 = vst [vmem:[%s361_s21 + $0x10] sm:$0xff] %v2068_v35   ;;  %2077 = vst [vmem:[%s361_s21 + $0x18] sm:$0xff] %v2073_v40  }
 0x510   : > { %1894 = vst [vmem:[%s361_s21 + $0x20] sm:$0xf] %v2054_v42 }
 0x511 PF: > { %s20_s13 = sadd.s32 1, %s2475_s13  }
 0x512   : > { %p17_p4 = scmp.ge.s32.totalorder %s20_s13, 4  }
 0x514   :  { %19 = sbr.rel (!%p17_p4) target bundleno = 1 (0x1), region = 90 }

</bundles_post_ra>
